<compile_context>
chip_gen: v5e
topology: v5e:2x2
jax: 0.10.0
libtpu: 0.0.40
codegen_flags: <defaults>
</compile_context>

<pallas_src>
import functools

import jax
import jax.numpy as jnp
from jax.experimental import pallas as pl
from jax.experimental.pallas import tpu as pltpu


def _fused_colorization_kernel(x_ref, w1_ref, b1_ref, w2_ref, b2_ref, o_ref,
                               xpad_ref, hpad_ref, *, H, W):
    # x_ref:    (1, 1, H, W)       VMEM   unpadded grayscale input (one image)
    # w1_ref:   (2*1*3*3,)         SMEM   PyTorch (Cout, Cin, kh, kw) flattened
    # b1_ref:   (2,)               SMEM
    # w2_ref:   (3*2*3*3,)         SMEM
    # b2_ref:   (3,)               SMEM
    # o_ref:    (1, 3, H, W)       VMEM   output (one image)
    # xpad_ref: (1, H+2, W+2)      VMEM scratch, spatially padded input
    # hpad_ref: (2, H+2, W+2)      VMEM scratch, spatially padded layer-1 output
    f32 = jnp.float32

    # ---- in-kernel zero padding (replaces wrapper-side jnp.pad) -------------
    # Zeroed every grid step (scratch state must not be relied on across
    # "parallel" iterations); interior writes below never touch the border.
    xpad_ref[...] = jnp.zeros_like(xpad_ref)
    hpad_ref[...] = jnp.zeros_like(hpad_ref)
    xpad_ref[0, 1:H + 1, 1:W + 1] = x_ref[0, 0, :, :].astype(f32)

    def conv3x3(src_ref, Cin, Cout, w_ref, b_ref, act):
        # Hoist the Cin*9 shifted (H, W) slabs once; reuse across all Cout.
        shifted = [
            [[src_ref[ci, dy:dy + H, dx:dx + W] for dx in range(3)]
             for dy in range(3)]
            for ci in range(Cin)
        ]
        outs = []
        for co in range(Cout):
            acc = jnp.full((H, W), b_ref[co], dtype=f32)
            for ci in range(Cin):
                for dy in range(3):
                    for dx in range(3):
                        wv = w_ref[((co * Cin + ci) * 3 + dy) * 3 + dx]
                        acc = acc + shifted[ci][dy][dx] * wv
            outs.append(act(acc))
        return outs

    # ---- layer 1: Conv(1 -> 2) + ReLU ---------------------------------------
    # TODO(synk): dropout(p=0.1) after conv1 is eval-mode identity here.
    h = conv3x3(xpad_ref, 1, 2, w1_ref, b1_ref, lambda a: jnp.maximum(a, 0.0))
    for co in range(2):
        hpad_ref[co, 1:H + 1, 1:W + 1] = h[co]   # stays in VMEM, never hits HBM

    # ---- layer 2: Conv(2 -> 3) + Sigmoid ------------------------------------
    y = conv3x3(hpad_ref, 2, 3, w2_ref, b2_ref, jax.nn.sigmoid)
    for co in range(3):
        o_ref[0, co, :, :] = y[co].astype(o_ref.dtype)


def colorization_ae_forward(x, params):
    """Fused two-layer forward pass of myColorizationAE (NCHW, eval mode)."""
    w1, b1, w2, b2 = params
    N, Cin, H, W = x.shape
    assert Cin == 1, "myColorizationAE expects a single-channel (grayscale) input"
    kernel = functools.partial(_fused_colorization_kernel, H=H, W=W)
    return pl.pallas_call(
        kernel,
        out_shape=jax.ShapeDtypeStruct((N, 3, H, W), x.dtype),
        grid=(N,),
        in_specs=[
            pl.BlockSpec((1, 1, H, W), lambda n: (n, 0, 0, 0)),         # image
            pl.BlockSpec(memory_space=pltpu.MemorySpace.SMEM),          # w1
            pl.BlockSpec(memory_space=pltpu.MemorySpace.SMEM),          # b1
            pl.BlockSpec(memory_space=pltpu.MemorySpace.SMEM),          # w2
            pl.BlockSpec(memory_space=pltpu.MemorySpace.SMEM),          # b2
        ],
        out_specs=pl.BlockSpec((1, 3, H, W), lambda n: (n, 0, 0, 0)),
        scratch_shapes=[
            pltpu.VMEM((1, H + 2, W + 2), jnp.float32),  # padded input
            pltpu.VMEM((2, H + 2, W + 2), jnp.float32),  # padded hidden h
        ],
        compiler_params=pltpu.CompilerParams(dimension_semantics=("parallel",)),
    )(x, w1.reshape(-1), b1, w2.reshape(-1), b2)


def init_params(key):
    """Deterministic synthetic parameters (PyTorch shapes: OIHW weights)."""
    k1, k2, k3, k4 = jax.random.split(key, 4)
    w1 = jax.random.normal(k1, (2, 1, 3, 3), jnp.float32) * 0.3
    b1 = jax.random.normal(k2, (2,), jnp.float32) * 0.1
    w2 = jax.random.normal(k3, (3, 2, 3, 3), jnp.float32) * 0.3
    b2 = jax.random.normal(k4, (3,), jnp.float32) * 0.1
    return w1, b1, w2, b2


def _conv_ref(x, w, b):
    y = jax.lax.conv_general_dilated(
        x, w, window_strides=(1, 1), padding=((1, 1), (1, 1)),
        dimension_numbers=("NCHW", "OIHW", "NCHW"),
    )
    return y + b[None, :, None, None]


def _forward_ref(x, params):
    w1, b1, w2, b2 = params
    h = jnp.maximum(_conv_ref(x, w1, b1), 0.0)
    return jax.nn.sigmoid(_conv_ref(h, w2, b2))


if __name__ == "__main__":
    key = jax.random.PRNGKey(0)
    kx, kp = jax.random.split(key)
    # grayscale input image batch: N=2, C=1, H=W=16 (NCHW, like PyTorch)
    x = jax.random.normal(kx, (2, 1, 16, 16), jnp.float32)
    params = init_params(kp)

    out = colorization_ae_forward(x, params)
    out = jax.block_until_ready(out)

    ref = _forward_ref(x, params)
    assert out.shape == (2, 3, 16, 16), out.shape
    assert jnp.allclose(out, ref, atol=1e-5, rtol=1e-5), "mismatch vs. reference"
    print("KERNEL_OK")
</pallas_src>

<mosaic_0001>
module attributes {stable_mosaic.version = 11 : i64} {
  func.func @_fused_colorization_kernel(%arg0: i32, %arg1: memref<1x1x16x16xf32, #tpu.memory_space<vmem>>, %arg2: memref<18xf32, #tpu.memory_space<smem>>, %arg3: memref<2xf32, #tpu.memory_space<smem>>, %arg4: memref<54xf32, #tpu.memory_space<smem>>, %arg5: memref<3xf32, #tpu.memory_space<smem>>, %arg6: memref<1x3x16x16xf32, #tpu.memory_space<vmem>>, %arg7: memref<1x18x18xf32, #tpu.memory_space<vmem>>, %arg8: memref<2x18x18xf32, #tpu.memory_space<vmem>>) attributes {dimension_semantics = [#tpu.dimension_semantics<parallel>], iteration_bounds = array<i64: 2>, scalar_prefetch = 0 : i64, scratch_operands = 2 : i64, tpu.core_type = #tpu.core_type<tc>, window_params = [{transform_indices = @transform_0, window_bounds = array<i64: 1, 1, 16, 16>}, {transform_indices = @transform_1, window_bounds = array<i64: 18>}, {transform_indices = @transform_2, window_bounds = array<i64: 2>}, {transform_indices = @transform_3, window_bounds = array<i64: 54>}, {transform_indices = @transform_4, window_bounds = array<i64: 3>}, {transform_indices = @transform_5, window_bounds = array<i64: 1, 3, 16, 16>}]} {
    %cst = arith.constant 0.000000e+00 : f32
    %0 = vector.broadcast %cst : f32 to vector<1x18x18xf32>
    %c0 = arith.constant 0 : index
    %c0_0 = arith.constant 0 : index
    %c0_1 = arith.constant 0 : index
    %1 = vector.load %arg7[%c0, %c0_0, %c0_1] : memref<1x18x18xf32, #tpu.memory_space<vmem>>, vector<1x18x18xf32>
    tpu.vector_store %arg7[%c0, %c0_0, %c0_1], %0 {strides = array<i32>} : memref<1x18x18xf32, #tpu.memory_space<vmem>>, vector<1x18x18xf32>,
    %cst_2 = arith.constant 0.000000e+00 : f32
    %2 = vector.broadcast %cst_2 : f32 to vector<2x18x18xf32>
    %c0_3 = arith.constant 0 : index
    %c0_4 = arith.constant 0 : index
    %c0_5 = arith.constant 0 : index
    %3 = vector.load %arg8[%c0_3, %c0_4, %c0_5] : memref<2x18x18xf32, #tpu.memory_space<vmem>>, vector<2x18x18xf32>
    tpu.vector_store %arg8[%c0_3, %c0_4, %c0_5], %2 {strides = array<i32>} : memref<2x18x18xf32, #tpu.memory_space<vmem>>, vector<2x18x18xf32>,
    %c0_6 = arith.constant 0 : index
    %c0_7 = arith.constant 0 : index
    %c0_8 = arith.constant 0 : index
    %c0_9 = arith.constant 0 : index
    %4 = vector.load %arg1[%c0_6, %c0_7, %c0_8, %c0_9] : memref<1x1x16x16xf32, #tpu.memory_space<vmem>>, vector<1x1x16x16xf32>
    %5 = vector.shape_cast %4 : vector<1x1x16x16xf32> to vector<16x16xf32>
    %c0_10 = arith.constant 0 : index
    %c1 = arith.constant 1 : index
    %c1_11 = arith.constant 1 : index
    %6 = vector.load %arg7[%c0_10, %c1, %c1_11] : memref<1x18x18xf32, #tpu.memory_space<vmem>>, vector<1x16x16xf32>
    %7 = vector.shape_cast %6 : vector<1x16x16xf32> to vector<16x16xf32>
    %8 = vector.shape_cast %5 : vector<16x16xf32> to vector<1x16x16xf32>
    tpu.vector_store %arg7[%c0_10, %c1, %c1_11], %8 {strides = array<i32>} : memref<1x18x18xf32, #tpu.memory_space<vmem>>, vector<1x16x16xf32>,
    %c0_12 = arith.constant 0 : index
    %c0_13 = arith.constant 0 : index
    %c0_14 = arith.constant 0 : index
    %9 = vector.load %arg7[%c0_12, %c0_13, %c0_14] : memref<1x18x18xf32, #tpu.memory_space<vmem>>, vector<1x16x16xf32>
    %10 = vector.shape_cast %9 : vector<1x16x16xf32> to vector<16x16xf32>
    %c0_15 = arith.constant 0 : index
    %c0_16 = arith.constant 0 : index
    %c1_17 = arith.constant 1 : index
    %11 = vector.load %arg7[%c0_15, %c0_16, %c1_17] : memref<1x18x18xf32, #tpu.memory_space<vmem>>, vector<1x16x16xf32>
    %12 = vector.shape_cast %11 : vector<1x16x16xf32> to vector<16x16xf32>
    %c0_18 = arith.constant 0 : index
    %c0_19 = arith.constant 0 : index
    %c2 = arith.constant 2 : index
    %13 = vector.load %arg7[%c0_18, %c0_19, %c2] : memref<1x18x18xf32, #tpu.memory_space<vmem>>, vector<1x16x16xf32>
    %14 = vector.shape_cast %13 : vector<1x16x16xf32> to vector<16x16xf32>
    %c0_20 = arith.constant 0 : index
    %c1_21 = arith.constant 1 : index
    %c0_22 = arith.constant 0 : index
    %15 = vector.load %arg7[%c0_20, %c1_21, %c0_22] : memref<1x18x18xf32, #tpu.memory_space<vmem>>, vector<1x16x16xf32>
    %16 = vector.shape_cast %15 : vector<1x16x16xf32> to vector<16x16xf32>
    %c0_23 = arith.constant 0 : index
    %c1_24 = arith.constant 1 : index
    %c1_25 = arith.constant 1 : index
    %17 = vector.load %arg7[%c0_23, %c1_24, %c1_25] : memref<1x18x18xf32, #tpu.memory_space<vmem>>, vector<1x16x16xf32>
    %18 = vector.shape_cast %17 : vector<1x16x16xf32> to vector<16x16xf32>
    %c0_26 = arith.constant 0 : index
    %c1_27 = arith.constant 1 : index
    %c2_28 = arith.constant 2 : index
    %19 = vector.load %arg7[%c0_26, %c1_27, %c2_28] : memref<1x18x18xf32, #tpu.memory_space<vmem>>, vector<1x16x16xf32>
    %20 = vector.shape_cast %19 : vector<1x16x16xf32> to vector<16x16xf32>
    %c0_29 = arith.constant 0 : index
    %c2_30 = arith.constant 2 : index
    %c0_31 = arith.constant 0 : index
    %21 = vector.load %arg7[%c0_29, %c2_30, %c0_31] : memref<1x18x18xf32, #tpu.memory_space<vmem>>, vector<1x16x16xf32>
    %22 = vector.shape_cast %21 : vector<1x16x16xf32> to vector<16x16xf32>
    %c0_32 = arith.constant 0 : index
    %c2_33 = arith.constant 2 : index
    %c1_34 = arith.constant 1 : index
    %23 = vector.load %arg7[%c0_32, %c2_33, %c1_34] : memref<1x18x18xf32, #tpu.memory_space<vmem>>, vector<1x16x16xf32>
    %24 = vector.shape_cast %23 : vector<1x16x16xf32> to vector<16x16xf32>
    %c0_35 = arith.constant 0 : index
    %c2_36 = arith.constant 2 : index
    %c2_37 = arith.constant 2 : index
    %25 = vector.load %arg7[%c0_35, %c2_36, %c2_37] : memref<1x18x18xf32, #tpu.memory_space<vmem>>, vector<1x16x16xf32>
    %26 = vector.shape_cast %25 : vector<1x16x16xf32> to vector<16x16xf32>
    %c0_38 = arith.constant 0 : index
    %27 = memref.load %arg3[%c0_38] : memref<2xf32, #tpu.memory_space<smem>>
    %28 = vector.broadcast %27 : f32 to vector<16x16xf32>
    %c0_39 = arith.constant 0 : index
    %29 = memref.load %arg2[%c0_39] : memref<18xf32, #tpu.memory_space<smem>>
    %30 = vector.broadcast %29 : f32 to vector<16x16xf32>
    %31 = arith.mulf %10, %30 : vector<16x16xf32>
    %32 = arith.addf %28, %31 : vector<16x16xf32>
    %c1_40 = arith.constant 1 : index
    %33 = memref.load %arg2[%c1_40] : memref<18xf32, #tpu.memory_space<smem>>
    %34 = vector.broadcast %33 : f32 to vector<16x16xf32>
    %35 = arith.mulf %12, %34 : vector<16x16xf32>
    %36 = arith.addf %32, %35 : vector<16x16xf32>
    %c2_41 = arith.constant 2 : index
    %37 = memref.load %arg2[%c2_41] : memref<18xf32, #tpu.memory_space<smem>>
    %38 = vector.broadcast %37 : f32 to vector<16x16xf32>
    %39 = arith.mulf %14, %38 : vector<16x16xf32>
    %40 = arith.addf %36, %39 : vector<16x16xf32>
    %c3 = arith.constant 3 : index
    %41 = memref.load %arg2[%c3] : memref<18xf32, #tpu.memory_space<smem>>
    %42 = vector.broadcast %41 : f32 to vector<16x16xf32>
    %43 = arith.mulf %16, %42 : vector<16x16xf32>
    %44 = arith.addf %40, %43 : vector<16x16xf32>
    %c4 = arith.constant 4 : index
    %45 = memref.load %arg2[%c4] : memref<18xf32, #tpu.memory_space<smem>>
    %46 = vector.broadcast %45 : f32 to vector<16x16xf32>
    %47 = arith.mulf %18, %46 : vector<16x16xf32>
    %48 = arith.addf %44, %47 : vector<16x16xf32>
    %c5 = arith.constant 5 : index
    %49 = memref.load %arg2[%c5] : memref<18xf32, #tpu.memory_space<smem>>
    %50 = vector.broadcast %49 : f32 to vector<16x16xf32>
    %51 = arith.mulf %20, %50 : vector<16x16xf32>
    %52 = arith.addf %48, %51 : vector<16x16xf32>
    %c6 = arith.constant 6 : index
    %53 = memref.load %arg2[%c6] : memref<18xf32, #tpu.memory_space<smem>>
    %54 = vector.broadcast %53 : f32 to vector<16x16xf32>
    %55 = arith.mulf %22, %54 : vector<16x16xf32>
    %56 = arith.addf %52, %55 : vector<16x16xf32>
    %c7 = arith.constant 7 : index
    %57 = memref.load %arg2[%c7] : memref<18xf32, #tpu.memory_space<smem>>
    %58 = vector.broadcast %57 : f32 to vector<16x16xf32>
    %59 = arith.mulf %24, %58 : vector<16x16xf32>
    %60 = arith.addf %56, %59 : vector<16x16xf32>
    %c8 = arith.constant 8 : index
    %61 = memref.load %arg2[%c8] : memref<18xf32, #tpu.memory_space<smem>>
    %62 = vector.broadcast %61 : f32 to vector<16x16xf32>
    %63 = arith.mulf %26, %62 : vector<16x16xf32>
    %64 = arith.addf %60, %63 : vector<16x16xf32>
    %cst_42 = arith.constant 0.000000e+00 : f32
    %65 = vector.broadcast %cst_42 : f32 to vector<16x16xf32>
    %66 = arith.maximumf %64, %65 : vector<16x16xf32>
    %c1_43 = arith.constant 1 : index
    %67 = memref.load %arg3[%c1_43] : memref<2xf32, #tpu.memory_space<smem>>
    %68 = vector.broadcast %67 : f32 to vector<16x16xf32>
    %c9 = arith.constant 9 : index
    %69 = memref.load %arg2[%c9] : memref<18xf32, #tpu.memory_space<smem>>
    %70 = vector.broadcast %69 : f32 to vector<16x16xf32>
    %71 = arith.mulf %10, %70 : vector<16x16xf32>
    %72 = arith.addf %68, %71 : vector<16x16xf32>
    %c10 = arith.constant 10 : index
    %73 = memref.load %arg2[%c10] : memref<18xf32, #tpu.memory_space<smem>>
    %74 = vector.broadcast %73 : f32 to vector<16x16xf32>
    %75 = arith.mulf %12, %74 : vector<16x16xf32>
    %76 = arith.addf %72, %75 : vector<16x16xf32>
    %c11 = arith.constant 11 : index
    %77 = memref.load %arg2[%c11] : memref<18xf32, #tpu.memory_space<smem>>
    %78 = vector.broadcast %77 : f32 to vector<16x16xf32>
    %79 = arith.mulf %14, %78 : vector<16x16xf32>
    %80 = arith.addf %76, %79 : vector<16x16xf32>
    %c12 = arith.constant 12 : index
    %81 = memref.load %arg2[%c12] : memref<18xf32, #tpu.memory_space<smem>>
    %82 = vector.broadcast %81 : f32 to vector<16x16xf32>
    %83 = arith.mulf %16, %82 : vector<16x16xf32>
    %84 = arith.addf %80, %83 : vector<16x16xf32>
    %c13 = arith.constant 13 : index
    %85 = memref.load %arg2[%c13] : memref<18xf32, #tpu.memory_space<smem>>
    %86 = vector.broadcast %85 : f32 to vector<16x16xf32>
    %87 = arith.mulf %18, %86 : vector<16x16xf32>
    %88 = arith.addf %84, %87 : vector<16x16xf32>
    %c14 = arith.constant 14 : index
    %89 = memref.load %arg2[%c14] : memref<18xf32, #tpu.memory_space<smem>>
    %90 = vector.broadcast %89 : f32 to vector<16x16xf32>
    %91 = arith.mulf %20, %90 : vector<16x16xf32>
    %92 = arith.addf %88, %91 : vector<16x16xf32>
    %c15 = arith.constant 15 : index
    %93 = memref.load %arg2[%c15] : memref<18xf32, #tpu.memory_space<smem>>
    %94 = vector.broadcast %93 : f32 to vector<16x16xf32>
    %95 = arith.mulf %22, %94 : vector<16x16xf32>
    %96 = arith.addf %92, %95 : vector<16x16xf32>
    %c16 = arith.constant 16 : index
    %97 = memref.load %arg2[%c16] : memref<18xf32, #tpu.memory_space<smem>>
    %98 = vector.broadcast %97 : f32 to vector<16x16xf32>
    %99 = arith.mulf %24, %98 : vector<16x16xf32>
    %100 = arith.addf %96, %99 : vector<16x16xf32>
    %c17 = arith.constant 17 : index
    %101 = memref.load %arg2[%c17] : memref<18xf32, #tpu.memory_space<smem>>
    %102 = vector.broadcast %101 : f32 to vector<16x16xf32>
    %103 = arith.mulf %26, %102 : vector<16x16xf32>
    %104 = arith.addf %100, %103 : vector<16x16xf32>
    %cst_44 = arith.constant 0.000000e+00 : f32
    %105 = vector.broadcast %cst_44 : f32 to vector<16x16xf32>
    %106 = arith.maximumf %104, %105 : vector<16x16xf32>
    %c0_45 = arith.constant 0 : index
    %c1_46 = arith.constant 1 : index
    %c1_47 = arith.constant 1 : index
    %107 = vector.load %arg8[%c0_45, %c1_46, %c1_47] : memref<2x18x18xf32, #tpu.memory_space<vmem>>, vector<1x16x16xf32>
    %108 = vector.shape_cast %107 : vector<1x16x16xf32> to vector<16x16xf32>
    %109 = vector.shape_cast %66 : vector<16x16xf32> to vector<1x16x16xf32>
    tpu.vector_store %arg8[%c0_45, %c1_46, %c1_47], %109 {strides = array<i32>} : memref<2x18x18xf32, #tpu.memory_space<vmem>>, vector<1x16x16xf32>,
    %c1_48 = arith.constant 1 : index
    %c1_49 = arith.constant 1 : index
    %c1_50 = arith.constant 1 : index
    %110 = vector.load %arg8[%c1_48, %c1_49, %c1_50] : memref<2x18x18xf32, #tpu.memory_space<vmem>>, vector<1x16x16xf32>
    %111 = vector.shape_cast %110 : vector<1x16x16xf32> to vector<16x16xf32>
    %112 = vector.shape_cast %106 : vector<16x16xf32> to vector<1x16x16xf32>
    tpu.vector_store %arg8[%c1_48, %c1_49, %c1_50], %112 {strides = array<i32>} : memref<2x18x18xf32, #tpu.memory_space<vmem>>, vector<1x16x16xf32>,
    %c0_51 = arith.constant 0 : index
    %c0_52 = arith.constant 0 : index
    %c0_53 = arith.constant 0 : index
    %113 = vector.load %arg8[%c0_51, %c0_52, %c0_53] : memref<2x18x18xf32, #tpu.memory_space<vmem>>, vector<1x16x16xf32>
    %114 = vector.shape_cast %113 : vector<1x16x16xf32> to vector<16x16xf32>
    %c0_54 = arith.constant 0 : index
    %c0_55 = arith.constant 0 : index
    %c1_56 = arith.constant 1 : index
    %115 = vector.load %arg8[%c0_54, %c0_55, %c1_56] : memref<2x18x18xf32, #tpu.memory_space<vmem>>, vector<1x16x16xf32>
    %116 = vector.shape_cast %115 : vector<1x16x16xf32> to vector<16x16xf32>
    %c0_57 = arith.constant 0 : index
    %c0_58 = arith.constant 0 : index
    %c2_59 = arith.constant 2 : index
    %117 = vector.load %arg8[%c0_57, %c0_58, %c2_59] : memref<2x18x18xf32, #tpu.memory_space<vmem>>, vector<1x16x16xf32>
    %118 = vector.shape_cast %117 : vector<1x16x16xf32> to vector<16x16xf32>
    %c0_60 = arith.constant 0 : index
    %c1_61 = arith.constant 1 : index
    %c0_62 = arith.constant 0 : index
    %119 = vector.load %arg8[%c0_60, %c1_61, %c0_62] : memref<2x18x18xf32, #tpu.memory_space<vmem>>, vector<1x16x16xf32>
    %120 = vector.shape_cast %119 : vector<1x16x16xf32> to vector<16x16xf32>
    %c0_63 = arith.constant 0 : index
    %c1_64 = arith.constant 1 : index
    %c1_65 = arith.constant 1 : index
    %121 = vector.load %arg8[%c0_63, %c1_64, %c1_65] : memref<2x18x18xf32, #tpu.memory_space<vmem>>, vector<1x16x16xf32>
    %122 = vector.shape_cast %121 : vector<1x16x16xf32> to vector<16x16xf32>
    %c0_66 = arith.constant 0 : index
    %c1_67 = arith.constant 1 : index
    %c2_68 = arith.constant 2 : index
    %123 = vector.load %arg8[%c0_66, %c1_67, %c2_68] : memref<2x18x18xf32, #tpu.memory_space<vmem>>, vector<1x16x16xf32>
    %124 = vector.shape_cast %123 : vector<1x16x16xf32> to vector<16x16xf32>
    %c0_69 = arith.constant 0 : index
    %c2_70 = arith.constant 2 : index
    %c0_71 = arith.constant 0 : index
    %125 = vector.load %arg8[%c0_69, %c2_70, %c0_71] : memref<2x18x18xf32, #tpu.memory_space<vmem>>, vector<1x16x16xf32>
    %126 = vector.shape_cast %125 : vector<1x16x16xf32> to vector<16x16xf32>
    %c0_72 = arith.constant 0 : index
    %c2_73 = arith.constant 2 : index
    %c1_74 = arith.constant 1 : index
    %127 = vector.load %arg8[%c0_72, %c2_73, %c1_74] : memref<2x18x18xf32, #tpu.memory_space<vmem>>, vector<1x16x16xf32>
    %128 = vector.shape_cast %127 : vector<1x16x16xf32> to vector<16x16xf32>
    %c0_75 = arith.constant 0 : index
    %c2_76 = arith.constant 2 : index
    %c2_77 = arith.constant 2 : index
    %129 = vector.load %arg8[%c0_75, %c2_76, %c2_77] : memref<2x18x18xf32, #tpu.memory_space<vmem>>, vector<1x16x16xf32>
    %130 = vector.shape_cast %129 : vector<1x16x16xf32> to vector<16x16xf32>
    %c1_78 = arith.constant 1 : index
    %c0_79 = arith.constant 0 : index
    %c0_80 = arith.constant 0 : index
    %131 = vector.load %arg8[%c1_78, %c0_79, %c0_80] : memref<2x18x18xf32, #tpu.memory_space<vmem>>, vector<1x16x16xf32>
    %132 = vector.shape_cast %131 : vector<1x16x16xf32> to vector<16x16xf32>
    %c1_81 = arith.constant 1 : index
    %c0_82 = arith.constant 0 : index
    %c1_83 = arith.constant 1 : index
    %133 = vector.load %arg8[%c1_81, %c0_82, %c1_83] : memref<2x18x18xf32, #tpu.memory_space<vmem>>, vector<1x16x16xf32>
    %134 = vector.shape_cast %133 : vector<1x16x16xf32> to vector<16x16xf32>
    %c1_84 = arith.constant 1 : index
    %c0_85 = arith.constant 0 : index
    %c2_86 = arith.constant 2 : index
    %135 = vector.load %arg8[%c1_84, %c0_85, %c2_86] : memref<2x18x18xf32, #tpu.memory_space<vmem>>, vector<1x16x16xf32>
    %136 = vector.shape_cast %135 : vector<1x16x16xf32> to vector<16x16xf32>
    %c1_87 = arith.constant 1 : index
    %c1_88 = arith.constant 1 : index
    %c0_89 = arith.constant 0 : index
    %137 = vector.load %arg8[%c1_87, %c1_88, %c0_89] : memref<2x18x18xf32, #tpu.memory_space<vmem>>, vector<1x16x16xf32>
    %138 = vector.shape_cast %137 : vector<1x16x16xf32> to vector<16x16xf32>
    %c1_90 = arith.constant 1 : index
    %c1_91 = arith.constant 1 : index
    %c1_92 = arith.constant 1 : index
    %139 = vector.load %arg8[%c1_90, %c1_91, %c1_92] : memref<2x18x18xf32, #tpu.memory_space<vmem>>, vector<1x16x16xf32>
    %140 = vector.shape_cast %139 : vector<1x16x16xf32> to vector<16x16xf32>
    %c1_93 = arith.constant 1 : index
    %c1_94 = arith.constant 1 : index
    %c2_95 = arith.constant 2 : index
    %141 = vector.load %arg8[%c1_93, %c1_94, %c2_95] : memref<2x18x18xf32, #tpu.memory_space<vmem>>, vector<1x16x16xf32>
    %142 = vector.shape_cast %141 : vector<1x16x16xf32> to vector<16x16xf32>
    %c1_96 = arith.constant 1 : index
    %c2_97 = arith.constant 2 : index
    %c0_98 = arith.constant 0 : index
    %143 = vector.load %arg8[%c1_96, %c2_97, %c0_98] : memref<2x18x18xf32, #tpu.memory_space<vmem>>, vector<1x16x16xf32>
    %144 = vector.shape_cast %143 : vector<1x16x16xf32> to vector<16x16xf32>
    %c1_99 = arith.constant 1 : index
    %c2_100 = arith.constant 2 : index
    %c1_101 = arith.constant 1 : index
    %145 = vector.load %arg8[%c1_99, %c2_100, %c1_101] : memref<2x18x18xf32, #tpu.memory_space<vmem>>, vector<1x16x16xf32>
    %146 = vector.shape_cast %145 : vector<1x16x16xf32> to vector<16x16xf32>
    %c1_102 = arith.constant 1 : index
    %c2_103 = arith.constant 2 : index
    %c2_104 = arith.constant 2 : index
    %147 = vector.load %arg8[%c1_102, %c2_103, %c2_104] : memref<2x18x18xf32, #tpu.memory_space<vmem>>, vector<1x16x16xf32>
    %148 = vector.shape_cast %147 : vector<1x16x16xf32> to vector<16x16xf32>
    %c0_105 = arith.constant 0 : index
    %149 = memref.load %arg5[%c0_105] : memref<3xf32, #tpu.memory_space<smem>>
    %150 = vector.broadcast %149 : f32 to vector<16x16xf32>
    %c0_106 = arith.constant 0 : index
    %151 = memref.load %arg4[%c0_106] : memref<54xf32, #tpu.memory_space<smem>>
    %152 = vector.broadcast %151 : f32 to vector<16x16xf32>
    %153 = arith.mulf %114, %152 : vector<16x16xf32>
    %154 = arith.addf %150, %153 : vector<16x16xf32>
    %c1_107 = arith.constant 1 : index
    %155 = memref.load %arg4[%c1_107] : memref<54xf32, #tpu.memory_space<smem>>
    %156 = vector.broadcast %155 : f32 to vector<16x16xf32>
    %157 = arith.mulf %116, %156 : vector<16x16xf32>
    %158 = arith.addf %154, %157 : vector<16x16xf32>
    %c2_108 = arith.constant 2 : index
    %159 = memref.load %arg4[%c2_108] : memref<54xf32, #tpu.memory_space<smem>>
    %160 = vector.broadcast %159 : f32 to vector<16x16xf32>
    %161 = arith.mulf %118, %160 : vector<16x16xf32>
    %162 = arith.addf %158, %161 : vector<16x16xf32>
    %c3_109 = arith.constant 3 : index
    %163 = memref.load %arg4[%c3_109] : memref<54xf32, #tpu.memory_space<smem>>
    %164 = vector.broadcast %163 : f32 to vector<16x16xf32>
    %165 = arith.mulf %120, %164 : vector<16x16xf32>
    %166 = arith.addf %162, %165 : vector<16x16xf32>
    %c4_110 = arith.constant 4 : index
    %167 = memref.load %arg4[%c4_110] : memref<54xf32, #tpu.memory_space<smem>>
    %168 = vector.broadcast %167 : f32 to vector<16x16xf32>
    %169 = arith.mulf %122, %168 : vector<16x16xf32>
    %170 = arith.addf %166, %169 : vector<16x16xf32>
    %c5_111 = arith.constant 5 : index
    %171 = memref.load %arg4[%c5_111] : memref<54xf32, #tpu.memory_space<smem>>
    %172 = vector.broadcast %171 : f32 to vector<16x16xf32>
    %173 = arith.mulf %124, %172 : vector<16x16xf32>
    %174 = arith.addf %170, %173 : vector<16x16xf32>
    %c6_112 = arith.constant 6 : index
    %175 = memref.load %arg4[%c6_112] : memref<54xf32, #tpu.memory_space<smem>>
    %176 = vector.broadcast %175 : f32 to vector<16x16xf32>
    %177 = arith.mulf %126, %176 : vector<16x16xf32>
    %178 = arith.addf %174, %177 : vector<16x16xf32>
    %c7_113 = arith.constant 7 : index
    %179 = memref.load %arg4[%c7_113] : memref<54xf32, #tpu.memory_space<smem>>
    %180 = vector.broadcast %179 : f32 to vector<16x16xf32>
    %181 = arith.mulf %128, %180 : vector<16x16xf32>
    %182 = arith.addf %178, %181 : vector<16x16xf32>
    %c8_114 = arith.constant 8 : index
    %183 = memref.load %arg4[%c8_114] : memref<54xf32, #tpu.memory_space<smem>>
    %184 = vector.broadcast %183 : f32 to vector<16x16xf32>
    %185 = arith.mulf %130, %184 : vector<16x16xf32>
    %186 = arith.addf %182, %185 : vector<16x16xf32>
    %c9_115 = arith.constant 9 : index
    %187 = memref.load %arg4[%c9_115] : memref<54xf32, #tpu.memory_space<smem>>
    %188 = vector.broadcast %187 : f32 to vector<16x16xf32>
    %189 = arith.mulf %132, %188 : vector<16x16xf32>
    %190 = arith.addf %186, %189 : vector<16x16xf32>
    %c10_116 = arith.constant 10 : index
    %191 = memref.load %arg4[%c10_116] : memref<54xf32, #tpu.memory_space<smem>>
    %192 = vector.broadcast %191 : f32 to vector<16x16xf32>
    %193 = arith.mulf %134, %192 : vector<16x16xf32>
    %194 = arith.addf %190, %193 : vector<16x16xf32>
    %c11_117 = arith.constant 11 : index
    %195 = memref.load %arg4[%c11_117] : memref<54xf32, #tpu.memory_space<smem>>
    %196 = vector.broadcast %195 : f32 to vector<16x16xf32>
    %197 = arith.mulf %136, %196 : vector<16x16xf32>
    %198 = arith.addf %194, %197 : vector<16x16xf32>
    %c12_118 = arith.constant 12 : index
    %199 = memref.load %arg4[%c12_118] : memref<54xf32, #tpu.memory_space<smem>>
    %200 = vector.broadcast %199 : f32 to vector<16x16xf32>
    %201 = arith.mulf %138, %200 : vector<16x16xf32>
    %202 = arith.addf %198, %201 : vector<16x16xf32>
    %c13_119 = arith.constant 13 : index
    %203 = memref.load %arg4[%c13_119] : memref<54xf32, #tpu.memory_space<smem>>
    %204 = vector.broadcast %203 : f32 to vector<16x16xf32>
    %205 = arith.mulf %140, %204 : vector<16x16xf32>
    %206 = arith.addf %202, %205 : vector<16x16xf32>
    %c14_120 = arith.constant 14 : index
    %207 = memref.load %arg4[%c14_120] : memref<54xf32, #tpu.memory_space<smem>>
    %208 = vector.broadcast %207 : f32 to vector<16x16xf32>
    %209 = arith.mulf %142, %208 : vector<16x16xf32>
    %210 = arith.addf %206, %209 : vector<16x16xf32>
    %c15_121 = arith.constant 15 : index
    %211 = memref.load %arg4[%c15_121] : memref<54xf32, #tpu.memory_space<smem>>
    %212 = vector.broadcast %211 : f32 to vector<16x16xf32>
    %213 = arith.mulf %144, %212 : vector<16x16xf32>
    %214 = arith.addf %210, %213 : vector<16x16xf32>
    %c16_122 = arith.constant 16 : index
    %215 = memref.load %arg4[%c16_122] : memref<54xf32, #tpu.memory_space<smem>>
    %216 = vector.broadcast %215 : f32 to vector<16x16xf32>
    %217 = arith.mulf %146, %216 : vector<16x16xf32>
    %218 = arith.addf %214, %217 : vector<16x16xf32>
    %c17_123 = arith.constant 17 : index
    %219 = memref.load %arg4[%c17_123] : memref<54xf32, #tpu.memory_space<smem>>
    %220 = vector.broadcast %219 : f32 to vector<16x16xf32>
    %221 = arith.mulf %148, %220 : vector<16x16xf32>
    %222 = arith.addf %218, %221 : vector<16x16xf32>
    %223 = arith.negf %222 : vector<16x16xf32>
    %224 = math.exp %223 : vector<16x16xf32>
    %cst_124 = arith.constant 1.000000e+00 : f32
    %225 = vector.broadcast %cst_124 : f32 to vector<16x16xf32>
    %226 = arith.addf %225, %224 : vector<16x16xf32>
    %227 = arith.divf %225, %226 : vector<16x16xf32>
    %c1_125 = arith.constant 1 : index
    %228 = memref.load %arg5[%c1_125] : memref<3xf32, #tpu.memory_space<smem>>
    %229 = vector.broadcast %228 : f32 to vector<16x16xf32>
    %c18 = arith.constant 18 : index
    %230 = memref.load %arg4[%c18] : memref<54xf32, #tpu.memory_space<smem>>
    %231 = vector.broadcast %230 : f32 to vector<16x16xf32>
    %232 = arith.mulf %114, %231 : vector<16x16xf32>
    %233 = arith.addf %229, %232 : vector<16x16xf32>
    %c19 = arith.constant 19 : index
    %234 = memref.load %arg4[%c19] : memref<54xf32, #tpu.memory_space<smem>>
    %235 = vector.broadcast %234 : f32 to vector<16x16xf32>
    %236 = arith.mulf %116, %235 : vector<16x16xf32>
    %237 = arith.addf %233, %236 : vector<16x16xf32>
    %c20 = arith.constant 20 : index
    %238 = memref.load %arg4[%c20] : memref<54xf32, #tpu.memory_space<smem>>
    %239 = vector.broadcast %238 : f32 to vector<16x16xf32>
    %240 = arith.mulf %118, %239 : vector<16x16xf32>
    %241 = arith.addf %237, %240 : vector<16x16xf32>
    %c21 = arith.constant 21 : index
    %242 = memref.load %arg4[%c21] : memref<54xf32, #tpu.memory_space<smem>>
    %243 = vector.broadcast %242 : f32 to vector<16x16xf32>
    %244 = arith.mulf %120, %243 : vector<16x16xf32>
    %245 = arith.addf %241, %244 : vector<16x16xf32>
    %c22 = arith.constant 22 : index
    %246 = memref.load %arg4[%c22] : memref<54xf32, #tpu.memory_space<smem>>
    %247 = vector.broadcast %246 : f32 to vector<16x16xf32>
    %248 = arith.mulf %122, %247 : vector<16x16xf32>
    %249 = arith.addf %245, %248 : vector<16x16xf32>
    %c23 = arith.constant 23 : index
    %250 = memref.load %arg4[%c23] : memref<54xf32, #tpu.memory_space<smem>>
    %251 = vector.broadcast %250 : f32 to vector<16x16xf32>
    %252 = arith.mulf %124, %251 : vector<16x16xf32>
    %253 = arith.addf %249, %252 : vector<16x16xf32>
    %c24 = arith.constant 24 : index
    %254 = memref.load %arg4[%c24] : memref<54xf32, #tpu.memory_space<smem>>
    %255 = vector.broadcast %254 : f32 to vector<16x16xf32>
    %256 = arith.mulf %126, %255 : vector<16x16xf32>
    %257 = arith.addf %253, %256 : vector<16x16xf32>
    %c25 = arith.constant 25 : index
    %258 = memref.load %arg4[%c25] : memref<54xf32, #tpu.memory_space<smem>>
    %259 = vector.broadcast %258 : f32 to vector<16x16xf32>
    %260 = arith.mulf %128, %259 : vector<16x16xf32>
    %261 = arith.addf %257, %260 : vector<16x16xf32>
    %c26 = arith.constant 26 : index
    %262 = memref.load %arg4[%c26] : memref<54xf32, #tpu.memory_space<smem>>
    %263 = vector.broadcast %262 : f32 to vector<16x16xf32>
    %264 = arith.mulf %130, %263 : vector<16x16xf32>
    %265 = arith.addf %261, %264 : vector<16x16xf32>
    %c27 = arith.constant 27 : index
    %266 = memref.load %arg4[%c27] : memref<54xf32, #tpu.memory_space<smem>>
    %267 = vector.broadcast %266 : f32 to vector<16x16xf32>
    %268 = arith.mulf %132, %267 : vector<16x16xf32>
    %269 = arith.addf %265, %268 : vector<16x16xf32>
    %c28 = arith.constant 28 : index
    %270 = memref.load %arg4[%c28] : memref<54xf32, #tpu.memory_space<smem>>
    %271 = vector.broadcast %270 : f32 to vector<16x16xf32>
    %272 = arith.mulf %134, %271 : vector<16x16xf32>
    %273 = arith.addf %269, %272 : vector<16x16xf32>
    %c29 = arith.constant 29 : index
    %274 = memref.load %arg4[%c29] : memref<54xf32, #tpu.memory_space<smem>>
    %275 = vector.broadcast %274 : f32 to vector<16x16xf32>
    %276 = arith.mulf %136, %275 : vector<16x16xf32>
    %277 = arith.addf %273, %276 : vector<16x16xf32>
    %c30 = arith.constant 30 : index
    %278 = memref.load %arg4[%c30] : memref<54xf32, #tpu.memory_space<smem>>
    %279 = vector.broadcast %278 : f32 to vector<16x16xf32>
    %280 = arith.mulf %138, %279 : vector<16x16xf32>
    %281 = arith.addf %277, %280 : vector<16x16xf32>
    %c31 = arith.constant 31 : index
    %282 = memref.load %arg4[%c31] : memref<54xf32, #tpu.memory_space<smem>>
    %283 = vector.broadcast %282 : f32 to vector<16x16xf32>
    %284 = arith.mulf %140, %283 : vector<16x16xf32>
    %285 = arith.addf %281, %284 : vector<16x16xf32>
    %c32 = arith.constant 32 : index
    %286 = memref.load %arg4[%c32] : memref<54xf32, #tpu.memory_space<smem>>
    %287 = vector.broadcast %286 : f32 to vector<16x16xf32>
    %288 = arith.mulf %142, %287 : vector<16x16xf32>
    %289 = arith.addf %285, %288 : vector<16x16xf32>
    %c33 = arith.constant 33 : index
    %290 = memref.load %arg4[%c33] : memref<54xf32, #tpu.memory_space<smem>>
    %291 = vector.broadcast %290 : f32 to vector<16x16xf32>
    %292 = arith.mulf %144, %291 : vector<16x16xf32>
    %293 = arith.addf %289, %292 : vector<16x16xf32>
    %c34 = arith.constant 34 : index
    %294 = memref.load %arg4[%c34] : memref<54xf32, #tpu.memory_space<smem>>
    %295 = vector.broadcast %294 : f32 to vector<16x16xf32>
    %296 = arith.mulf %146, %295 : vector<16x16xf32>
    %297 = arith.addf %293, %296 : vector<16x16xf32>
    %c35 = arith.constant 35 : index
    %298 = memref.load %arg4[%c35] : memref<54xf32, #tpu.memory_space<smem>>
    %299 = vector.broadcast %298 : f32 to vector<16x16xf32>
    %300 = arith.mulf %148, %299 : vector<16x16xf32>
    %301 = arith.addf %297, %300 : vector<16x16xf32>
    %302 = arith.negf %301 : vector<16x16xf32>
    %303 = math.exp %302 : vector<16x16xf32>
    %cst_126 = arith.constant 1.000000e+00 : f32
    %304 = vector.broadcast %cst_126 : f32 to vector<16x16xf32>
    %305 = arith.addf %304, %303 : vector<16x16xf32>
    %306 = arith.divf %304, %305 : vector<16x16xf32>
    %c2_127 = arith.constant 2 : index
    %307 = memref.load %arg5[%c2_127] : memref<3xf32, #tpu.memory_space<smem>>
    %308 = vector.broadcast %307 : f32 to vector<16x16xf32>
    %c36 = arith.constant 36 : index
    %309 = memref.load %arg4[%c36] : memref<54xf32, #tpu.memory_space<smem>>
    %310 = vector.broadcast %309 : f32 to vector<16x16xf32>
    %311 = arith.mulf %114, %310 : vector<16x16xf32>
    %312 = arith.addf %308, %311 : vector<16x16xf32>
    %c37 = arith.constant 37 : index
    %313 = memref.load %arg4[%c37] : memref<54xf32, #tpu.memory_space<smem>>
    %314 = vector.broadcast %313 : f32 to vector<16x16xf32>
    %315 = arith.mulf %116, %314 : vector<16x16xf32>
    %316 = arith.addf %312, %315 : vector<16x16xf32>
    %c38 = arith.constant 38 : index
    %317 = memref.load %arg4[%c38] : memref<54xf32, #tpu.memory_space<smem>>
    %318 = vector.broadcast %317 : f32 to vector<16x16xf32>
    %319 = arith.mulf %118, %318 : vector<16x16xf32>
    %320 = arith.addf %316, %319 : vector<16x16xf32>
    %c39 = arith.constant 39 : index
    %321 = memref.load %arg4[%c39] : memref<54xf32, #tpu.memory_space<smem>>
    %322 = vector.broadcast %321 : f32 to vector<16x16xf32>
    %323 = arith.mulf %120, %322 : vector<16x16xf32>
    %324 = arith.addf %320, %323 : vector<16x16xf32>
    %c40 = arith.constant 40 : index
    %325 = memref.load %arg4[%c40] : memref<54xf32, #tpu.memory_space<smem>>
    %326 = vector.broadcast %325 : f32 to vector<16x16xf32>
    %327 = arith.mulf %122, %326 : vector<16x16xf32>
    %328 = arith.addf %324, %327 : vector<16x16xf32>
    %c41 = arith.constant 41 : index
    %329 = memref.load %arg4[%c41] : memref<54xf32, #tpu.memory_space<smem>>
    %330 = vector.broadcast %329 : f32 to vector<16x16xf32>
    %331 = arith.mulf %124, %330 : vector<16x16xf32>
    %332 = arith.addf %328, %331 : vector<16x16xf32>
    %c42 = arith.constant 42 : index
    %333 = memref.load %arg4[%c42] : memref<54xf32, #tpu.memory_space<smem>>
    %334 = vector.broadcast %333 : f32 to vector<16x16xf32>
    %335 = arith.mulf %126, %334 : vector<16x16xf32>
    %336 = arith.addf %332, %335 : vector<16x16xf32>
    %c43 = arith.constant 43 : index
    %337 = memref.load %arg4[%c43] : memref<54xf32, #tpu.memory_space<smem>>
    %338 = vector.broadcast %337 : f32 to vector<16x16xf32>
    %339 = arith.mulf %128, %338 : vector<16x16xf32>
    %340 = arith.addf %336, %339 : vector<16x16xf32>
    %c44 = arith.constant 44 : index
    %341 = memref.load %arg4[%c44] : memref<54xf32, #tpu.memory_space<smem>>
    %342 = vector.broadcast %341 : f32 to vector<16x16xf32>
    %343 = arith.mulf %130, %342 : vector<16x16xf32>
    %344 = arith.addf %340, %343 : vector<16x16xf32>
    %c45 = arith.constant 45 : index
    %345 = memref.load %arg4[%c45] : memref<54xf32, #tpu.memory_space<smem>>
    %346 = vector.broadcast %345 : f32 to vector<16x16xf32>
    %347 = arith.mulf %132, %346 : vector<16x16xf32>
    %348 = arith.addf %344, %347 : vector<16x16xf32>
    %c46 = arith.constant 46 : index
    %349 = memref.load %arg4[%c46] : memref<54xf32, #tpu.memory_space<smem>>
    %350 = vector.broadcast %349 : f32 to vector<16x16xf32>
    %351 = arith.mulf %134, %350 : vector<16x16xf32>
    %352 = arith.addf %348, %351 : vector<16x16xf32>
    %c47 = arith.constant 47 : index
    %353 = memref.load %arg4[%c47] : memref<54xf32, #tpu.memory_space<smem>>
    %354 = vector.broadcast %353 : f32 to vector<16x16xf32>
    %355 = arith.mulf %136, %354 : vector<16x16xf32>
    %356 = arith.addf %352, %355 : vector<16x16xf32>
    %c48 = arith.constant 48 : index
    %357 = memref.load %arg4[%c48] : memref<54xf32, #tpu.memory_space<smem>>
    %358 = vector.broadcast %357 : f32 to vector<16x16xf32>
    %359 = arith.mulf %138, %358 : vector<16x16xf32>
    %360 = arith.addf %356, %359 : vector<16x16xf32>
    %c49 = arith.constant 49 : index
    %361 = memref.load %arg4[%c49] : memref<54xf32, #tpu.memory_space<smem>>
    %362 = vector.broadcast %361 : f32 to vector<16x16xf32>
    %363 = arith.mulf %140, %362 : vector<16x16xf32>
    %364 = arith.addf %360, %363 : vector<16x16xf32>
    %c50 = arith.constant 50 : index
    %365 = memref.load %arg4[%c50] : memref<54xf32, #tpu.memory_space<smem>>
    %366 = vector.broadcast %365 : f32 to vector<16x16xf32>
    %367 = arith.mulf %142, %366 : vector<16x16xf32>
    %368 = arith.addf %364, %367 : vector<16x16xf32>
    %c51 = arith.constant 51 : index
    %369 = memref.load %arg4[%c51] : memref<54xf32, #tpu.memory_space<smem>>
    %370 = vector.broadcast %369 : f32 to vector<16x16xf32>
    %371 = arith.mulf %144, %370 : vector<16x16xf32>
    %372 = arith.addf %368, %371 : vector<16x16xf32>
    %c52 = arith.constant 52 : index
    %373 = memref.load %arg4[%c52] : memref<54xf32, #tpu.memory_space<smem>>
    %374 = vector.broadcast %373 : f32 to vector<16x16xf32>
    %375 = arith.mulf %146, %374 : vector<16x16xf32>
    %376 = arith.addf %372, %375 : vector<16x16xf32>
    %c53 = arith.constant 53 : index
    %377 = memref.load %arg4[%c53] : memref<54xf32, #tpu.memory_space<smem>>
    %378 = vector.broadcast %377 : f32 to vector<16x16xf32>
    %379 = arith.mulf %148, %378 : vector<16x16xf32>
    %380 = arith.addf %376, %379 : vector<16x16xf32>
    %381 = arith.negf %380 : vector<16x16xf32>
    %382 = math.exp %381 : vector<16x16xf32>
    %cst_128 = arith.constant 1.000000e+00 : f32
    %383 = vector.broadcast %cst_128 : f32 to vector<16x16xf32>
    %384 = arith.addf %383, %382 : vector<16x16xf32>
    %385 = arith.divf %383, %384 : vector<16x16xf32>
    %c0_129 = arith.constant 0 : index
    %c0_130 = arith.constant 0 : index
    %c0_131 = arith.constant 0 : index
    %c0_132 = arith.constant 0 : index
    %386 = vector.load %arg6[%c0_129, %c0_130, %c0_131, %c0_132] : memref<1x3x16x16xf32, #tpu.memory_space<vmem>>, vector<1x1x16x16xf32>
    %387 = vector.shape_cast %386 : vector<1x1x16x16xf32> to vector<16x16xf32>
    %388 = vector.shape_cast %227 : vector<16x16xf32> to vector<1x1x16x16xf32>
    tpu.vector_store %arg6[%c0_129, %c0_130, %c0_131, %c0_132], %388 {strides = array<i32>} : memref<1x3x16x16xf32, #tpu.memory_space<vmem>>, vector<1x1x16x16xf32>,
    %c0_133 = arith.constant 0 : index
    %c1_134 = arith.constant 1 : index
    %c0_135 = arith.constant 0 : index
    %c0_136 = arith.constant 0 : index
    %389 = vector.load %arg6[%c0_133, %c1_134, %c0_135, %c0_136] : memref<1x3x16x16xf32, #tpu.memory_space<vmem>>, vector<1x1x16x16xf32>
    %390 = vector.shape_cast %389 : vector<1x1x16x16xf32> to vector<16x16xf32>
    %391 = vector.shape_cast %306 : vector<16x16xf32> to vector<1x1x16x16xf32>
    tpu.vector_store %arg6[%c0_133, %c1_134, %c0_135, %c0_136], %391 {strides = array<i32>} : memref<1x3x16x16xf32, #tpu.memory_space<vmem>>, vector<1x1x16x16xf32>,
    %c0_137 = arith.constant 0 : index
    %c2_138 = arith.constant 2 : index
    %c0_139 = arith.constant 0 : index
    %c0_140 = arith.constant 0 : index
    %392 = vector.load %arg6[%c0_137, %c2_138, %c0_139, %c0_140] : memref<1x3x16x16xf32, #tpu.memory_space<vmem>>, vector<1x1x16x16xf32>
    %393 = vector.shape_cast %392 : vector<1x1x16x16xf32> to vector<16x16xf32>
    %394 = vector.shape_cast %385 : vector<16x16xf32> to vector<1x1x16x16xf32>
    tpu.vector_store %arg6[%c0_137, %c2_138, %c0_139, %c0_140], %394 {strides = array<i32>} : memref<1x3x16x16xf32, #tpu.memory_space<vmem>>, vector<1x1x16x16xf32>,
    return
  }
  func.func @transform_0(%arg0: i32) -> (i32, i32, i32, i32) {
    %c0_i32 = arith.constant 0 : i32
    %c0_i32_0 = arith.constant 0 : i32
    %c0_i32_1 = arith.constant 0 : i32
    %c0_i32_2 = arith.constant 0 : i32
    return %arg0, %c0_i32, %c0_i32_0, %c0_i32_1 : i32, i32, i32, i32
  }
  func.func @transform_1(%arg0: i32) -> i32 {
    %c0_i32 = arith.constant 0 : i32
    %c0_i32_0 = arith.constant 0 : i32
    return %c0_i32 : i32
  }
  func.func @transform_2(%arg0: i32) -> i32 {
    %c0_i32 = arith.constant 0 : i32
    %c0_i32_0 = arith.constant 0 : i32
    return %c0_i32 : i32
  }
  func.func @transform_3(%arg0: i32) -> i32 {
    %c0_i32 = arith.constant 0 : i32
    %c0_i32_0 = arith.constant 0 : i32
    return %c0_i32 : i32
  }
  func.func @transform_4(%arg0: i32) -> i32 {
    %c0_i32 = arith.constant 0 : i32
    %c0_i32_0 = arith.constant 0 : i32
    return %c0_i32 : i32
  }
  func.func @transform_5(%arg0: i32) -> (i32, i32, i32, i32) {
    %c0_i32 = arith.constant 0 : i32
    %c0_i32_0 = arith.constant 0 : i32
    %c0_i32_1 = arith.constant 0 : i32
    %c0_i32_2 = arith.constant 0 : i32
    return %arg0, %c0_i32, %c0_i32_0, %c0_i32_1 : i32, i32, i32, i32
  }
}

</mosaic_0001>

<bundles_post_ra>
// kernel: tpu_custom_call.1
= control target key start
LH: loop header
LB: loop body
LE: loop exit
PB: predicated region body
PF: predicated region fallthrough
CT: control target
= control target key end

     0   :  { %10 = vsyncpa [#allocation5], 0  ;;  %s2477_s0 = inlined_call_operand.hbm [shape: f32[2,1,16,16], index: 0, kind: input, shape index: {}]   ;;  %s2478_s1 = inlined_call_operand.hbm [shape: f32[18], index: 1, kind: input, shape index: {}]   ;;  %s2479_s2 = inlined_call_operand.vmem [shape: f32[2], index: 2, kind: input, shape index: {}]   ;;  %s2480_s3 = inlined_call_operand.vmem [shape: f32[54], index: 3, kind: input, shape index: {}]   ;;  %s2481_s4 = inlined_call_operand.vmem [shape: f32[3], index: 4, kind: input, shape index: {}]   ;;  %s2482_s5 = inlined_call_operand.hbm [shape: f32[2,3,16,16], index: 5, kind: output, shape index: {}]  }
   0x1   :  { %12 = vsyncpa [#allocation5 + $0x1], 0 }
   0x2   :  { %13 = vsyncpa [#allocation7], 0 }
   0x3   :  { %14 = vsyncpa [#allocation8], 0 }
   0x4   :  { %15 = vsyncpa [#allocation12], 0 }
   0x5   :  { %16 = vsyncpa [#allocation6], 0 }
   0x6   :  { %18 = vsyncpa [#allocation6 + $0x1], 0  ;;  %s1881_s18 = smov 0   ;;  %s1883_s19 = smov 0  }
   0x7   :  { %s1885_s20 = smov 0   ;;  %s1887_s21 = smov 0  }
   0x8 LB: > { %s1902_s22 = sadd.s32 4294967295, %s1837_s21   ;;  %s1445_s23 = sadd.s32 4294967294, %s1837_s21   ;;  %s1837_s21 = sphi %s1887_s21, %s2492_s21   ;;  %s1833_s20 = sphi %s1885_s20, %s2491_s20   ;;  %s1829_s19 = sphi %s1883_s19, %s2490_s19   ;;  %s1825_s18 = sphi %s1881_s18, %s2489_s18  }
   0x9   : > { %p44_p0 = scmp.ne.s32.totalorder %s1829_s19, %s1825_s18  ;;  %p45_p1 = scmp.eq.s32.totalorder %s1902_s22, 0 }
   0xa   : > { %p152_p2 = scmp.eq.s32.totalorder %s1902_s22, 1  ;;  %p158_p3 = scmp.eq.s32.totalorder %s1445_s23, 1 }
   0xb   : > { %p1911_p4 = por %p45_p1, %p44_p0  ;;  %p1446_p5 = scmp.ge.s32.totalorder %s1837_s21, 1 }
   0xc   : > { %p1916_p6 = por %p158_p3, %p44_p0  ;;  %p165_p7 = scmp.lt.s32.totalorder %s1837_s21, 3 }
   0xd   : > { %s197_s28 = sshll.u32 %s2480_s3, 4  ;;  %s177_s7 = sshll.u32 %s2478_s1, 4  ;;  %s198_s28 = int_to_ptr.vmem [resolvable:$true] %s197_s28  ;;  %s178_s7 = int_to_ptr.hbm [resolvable:$true] %s177_s7 }
   0xe   : > { %p1924_p8 = pnand %p1446_p5, %p165_p7  ;;  %s187_s10 = sshll.u32 %s2479_s2, 4  ;;  %s188_s10 = int_to_ptr.vmem [resolvable:$true] %s187_s10 }
   0xf   : > { %s207_s13 = sshll.u32 %s2481_s4, 4  ;;  %s1839_s14 = smov [#allocation11]   ;;  %s208_s13 = int_to_ptr.vmem [resolvable:$true] %s207_s13 }
  0x10   : > { %p1570_p10 = pneg %p1924_p8  ;;  %s1840_s15 = smov [#allocation9]  }
  0x11   : > { %s1841_s16 = smov [#allocation10]   ;;  %s1842_s17 = smov [#allocation13]  }
  0x12   : > { %p1571_p11 = pnand %p1570_p10, %p45_p1  ;;  %s1943_s23 = sadd.s32 1, %s1837_s21  }
  0x13   : > { %s28_s26 = ssub.s32 %s1837_s21, %s1943_s23  ;;  %s31_s27 = sadd.s32 1, %s1833_s20 }
  0x14   : > { %1579 = dma.vmem_to_smem (!%p1571_p11), %s198_s28, 16, %s1839_s14, [#allocation12]  }
  0x15   : > { %1573 = dma.hbm_to_smem (!%p1571_p11), %s178_s7, 16, %s1840_s15, [#allocation7]  }
  0x16   : > { %1576 = dma.vmem_to_smem (!%p1571_p11), %s188_s10, 16, %s1841_s16, [#allocation8]  }
  0x17   : > { %1582 = dma.vmem_to_smem (!%p1571_p11), %s208_s13, 16, %s1842_s17, [#allocation12]  }
  0x18   : > { %p29_p12 = scmp.eq.s32.totalorder %s28_s26, 0  ;;  %p38_p13 = scmp.ne.s32.totalorder %s1833_s20, %s1829_s19 }
  0x19   : > { %p39_p0 = scmp.eq.s32.totalorder %s1837_s21, 0  ;;  %p1595_p7 = scmp.lt.s32.totalorder %s1837_s21, 2 }
  0x1a   : > { %s1952_s28 = scalar_select %p29_p12, %s1833_s20, %s31_s27  }
  0x1b   : > { %p40_p3 = por %p39_p0, %p38_p13  ;;  %p1956_p5 = por %p152_p2, %p38_p13 }
  0x1c   : > { %s218_s6 = sand.u32 1, %s1833_s20   ;;  %s1547_s8 = sshll.u32 %s1837_s21, 4 }
  0x1d   : > { %s1452_s7 = sshll.u32 %s218_s6, 4  ;;  %s227_s11 = scalar_lea.hbm %s2477_s0, %s1547_s8 }
  0x1e   : > { %s222_s12 = scalar_lea.vmem [#allocation4], %s1452_s7  ;;  %s228_s14 = sshll.u32 %s227_s11, 4  ;;  %s229_s14 = int_to_ptr.hbm [resolvable:$true] %s228_s14 }
  0x1f   : > { %s230_s13 = sshll.u32 %s222_s12, 4  ;;  %p1966_p10 = pnand %p1595_p7, %p40_p3  ;;  %s231_s13 = int_to_ptr.vmem [resolvable:$true] %s230_s13 }
  0x20   : > { %s219_s16 = scalar_lea.sflag [#allocation5], %s218_s6  ;;  %s1729_s17 = sshra.s32 %s229_s14, 4  ;;  %s1730_s17 = int_to_ptr.hbm [resolvable:$true] %s1729_s17 }
  0x21   : > { %s1731_s26 = scalar_lea.hbm %s1730_s17, 16  ;;  %p1733_p11 = pneg %p1966_p10 }
  0x22   : > { %p1732_p2 = scmp.ne.s32.totalorder %s1730_s17, %s1731_s26  ;;  %s1736_s8 = scalar_lea.hbm %s2477_s0, 32 }
  0x23   : > { %p1737_p0 = scmp.lt.s32.totalorder %s1730_s17, %s2477_s0  ;;  %p1738_p3 = scmp.lt.s32.totalorder %s1736_s8, %s1731_s26 }
  0x24   : > { %p1734_p12 = pnand %p1733_p11, %p1732_p2 }
  0x25   : > { %p1739_p7 = por %p1738_p3, %p1737_p0 }
  0x26   : > { %p1735_p13 = pneg %p1734_p12 }
  0x28   : > { %p1740_p9 = pnand %p1739_p7, %p1735_p13 }
  0x2a   : > { %1743 = shalt.err (!%p1740_p9)
}
  0x2b   : > { %s1843_s6 = smov 128   ;;  %s1844_s11 = smov 8  }
  0x2c   : > { %1586 = dma.hbm_to_vmem [thread:$0]  (!%p1966_p10), %s229_s14, 256, %s231_s13, %s219_s16, %s1843_s6, %s1843_s6, %s1844_s11  }
  0x2d   : > { %242 = sbr.rel (%p1924_p8) target bundleno = 796 (0x31c), region = 40  ;;  %s1983_s12 = sand.u32 (!%p1924_p8), 1, %s1829_s19  }
  0x2e   : > { %s1456_s27 = sshll.u32 (!%p1924_p8), %s1983_s12, 4  ;;  %s245_s17 = scalar_lea.sflag (!%p1924_p8), [#allocation5], %s1983_s12 }
  0x2f   : > { %s248_s26 = scalar_lea.vmem (!%p1924_p8), [#allocation4], %s1456_s27 }
  0x32   : > { %1804 = dma.done.wait (%p1911_p4), %s245_s17, 256  }
  0x33   : > { %1806 = vsyncadd (%p1911_p4), %s245_s17, 4294967040 }
  0x34   : > { %1808 = dma.done.wait (%p45_p1), [#allocation7], 16  }
  0x35   : > { %1810 = vsyncadd (%p45_p1), [#allocation7], 4294967280 }
  0x36   : > { %1812 = dma.done.wait (%p45_p1), [#allocation8], 16  }
  0x37   : > { %1814 = vsyncadd (%p45_p1), [#allocation8], 4294967280 }
  0x38   : > { %1816 = dma.done.wait (%p45_p1), [#allocation12], 32  }
  0x39   : > { %1818 = vsyncadd (%p45_p1), [#allocation12], 4294967264 }
  0x3a   : > { %274 = sfence }
  0x3b   : > { %v308_v0 = vld [vmem:[%s248_s26] sm:$0xff]  ;;  %s1845_s24 = smov 1   ;;  %v309_v1 = vld [vmem:[%s248_s26 + $0x8] sm:$0xff]  ;;  %vm297_vm0 = vcmask 146432   ;;  %v1846_v2 = vmov 0.0   ;;  %vm300_vm1 = vcmask 140288  }
  0x3c   : > { %312 = vrot.lane.b32.xlu0 %v308_v0, %s1845_s24  ;;  %298 = vst.msk [vmem:[#allocation2] sm:$0xff] %vm297_vm0, %v1846_v2  ;;  %s2005_s29 = sld [smem:[#allocation9 + $0x4]]  ;;  %vm318_vm2 = vcmask 138248   ;;  %s1847_s16 = smov 127   ;;  %vm1304_vm4 = vcmask 130048  }
  0x3d   : > { %299 = vst.msk [vmem:[#allocation2 + $0x8] sm:$0xff] %vm297_vm0, %v1846_v2  ;;  %s1462_s13 = sld [smem:[#allocation9 + $0x2]]  ;;  %s1848_s7 = smov 126  }
  0x3e   : > { %302 = vst.msk [vmem:[#allocation3] sm:$0xff] %vm297_vm0, %v1846_v2  ;;  %s1461_s14 = sld [smem:[#allocation9 + $0x1]] }
  0x3f   : > { %303 = vst.msk [vmem:[#allocation3 + $0x8] sm:$0xff] %vm297_vm0, %v1846_v2  ;;  %s1465_s15 = sld [smem:[#allocation9 + $0x5]] }
  0x40   : > { %305 = vst.msk [vmem:[#allocation3 + $0x18] sm:$0xff] %vm297_vm0, %v1846_v2  ;;  %s2020_s8 = sld [smem:[#allocation9 + $0x8]] }
  0x41   : > { %306 = vst.msk [vmem:[#allocation3 + $0x20] sm:$0xff] %vm297_vm0, %v1846_v2  ;;  %s1467_s9 = sld [smem:[#allocation9 + $0x7]] }
  0x42   : > { %301 = vst.msk [vmem:[#allocation2 + $0x10] sm:$0x3] %vm300_vm1, %v1846_v2  ;;  %v370_v4 = vstv %s2005_s29  ;;  %s1471_s10 = sld [smem:[#allocation9 + $0xa]] }
  0x43   : > { %304 = vst.msk [vmem:[#allocation3 + $0x10] sm:$0x3] %vm300_vm1, %v1846_v2  ;;  %v350_v5 = vstv %s1462_s13  ;;  %s1474_s6 = sld [smem:[#allocation9 + $0xd]] }
  0x44   : > { %314 = vrot.lane.b32.xlu0 %v309_v1, %s1845_s24  ;;  %307 = vst.msk [vmem:[#allocation3 + $0x28] sm:$0x3] %vm300_vm1, %v1846_v2  ;;  %v336_v6 = vstv %s1461_s14  ;;  %s1472_s11 = sld [smem:[#allocation9 + $0xb]] }
  0x45   : > { %v384_v15 = vstv %s1465_s15  ;;  %s1475_s27 = sld [smem:[#allocation9 + $0xe]] }
  0x46   : > { %v418_v20 = vstv %s2020_s8  ;;  %s1478_s17 = sld [smem:[#allocation9 + $0x11]] }
  0x47   : > { %v404_v25 = vstv %s1467_s9  ;;  %s1477_s26 = sld [smem:[#allocation9 + $0x10]] }
  0x48   : > { %v442_v26 = vstv %s1471_s10  ;;  %s329_s29 = sld [smem:[#allocation9]] }
  0x49   : > { %v476_v30 = vstv %s1474_s6  ;;  %s327_s13 = sld [smem:[#allocation10]] }
  0x4a   : > { %v456_v34 = vstv %s1472_s11  ;;  %s1463_s14 = sld [smem:[#allocation9 + $0x3]] }
  0x4b   : > { %v490_v35 = vstv %s1475_s27  ;;  %s2074_s15 = sld [smem:[#allocation9 + $0x6]] }
  0x4c   : > { %v524_v39 = vstv %s1478_s17  ;;  %s2079_s8 = sld [smem:[#allocation9 + $0x9]] }
  0x4d   : > { %v510_v43 = vstv %s1477_s26  ;;  %s2083_s9 = sld [smem:[#allocation10 + $0x1]] }
  0x4e   : > { %v330_v49 = vstv %s329_s29  ;;  %s1473_s10 = sld [smem:[#allocation9 + $0xc]] }
  0x4f   : > { %v328_v52 = vstv %s327_s13  ;;  %s1476_s6 = sld [smem:[#allocation9 + $0xf]] }
  0x50   : > { %v364_v55 = vstv %s1463_s14  ;;  %s1480_s11 = sld [smem:[#allocation11 + $0x2]] }
  0x51   : > { %v398_v63 = vstv %s2074_s15  ;;  %s1479_s27 = sld [smem:[#allocation11 + $0x1]] }
  0x52   : > { %s1482_s17 = sld [smem:[#allocation11 + $0x4]] }
  0x53   : > { %s1483_s26 = sld [smem:[#allocation11 + $0x5]] }
  0x54   : > { %s1486_s29 = sld [smem:[#allocation11 + $0x8]] }
  0x55   : > { %s1489_s13 = sld [smem:[#allocation11 + $0xb]] }
  0x56   : > { %s1488_s14 = sld [smem:[#allocation11 + $0xa]] }
  0x57   : > { %s1491_s15 = sld [smem:[#allocation11 + $0xd]] }
  0xae   : > { %v313_v3 = vpop.permute.xlu0 %312 }
  0xaf   : > { %319 = vst.msk [vmem:[#allocation2 + $0x1] sm:$0xff] %vm318_vm2, %v313_v3 }
  0xb6   : > { %v315_v7 = vpop.permute.xlu0 %314  ;;  %v2009_v8 = vld [vmem:[#allocation2 + $0x1] sm:$0xff] }
  0xb7   : > { %v2011_v9 = vld [vmem:[#allocation2] sm:$0xff]  ;;  %320 = vst.msk [vmem:[#allocation2 + $0x9] sm:$0xff] %vm318_vm2, %v315_v7  ;;  %v371_v10 = vmul.f32 %v370_v4, %v2009_v8  ;;  %v385_v22 = vmul.f32 %v384_v15, %v2009_v8  ;;  %v477_v31 = vmul.f32 %v476_v30, %v2009_v8  ;;  %v491_v41 = vmul.f32 %v490_v35, %v2009_v8 }
  0xb8   : > { %v351_v11 = vmul.f32 %v350_v5, %v2011_v9  ;;  %v337_v12 = vmul.f32 %v336_v6, %v2011_v9  ;;  %v443_v32 = vmul.f32 %v442_v26, %v2011_v9  ;;  %v457_v38 = vmul.f32 %v456_v34, %v2011_v9 }
  0xb9   : > { %375 = vrot.lane.b32.xlu0 %v371_v10, %s1847_s16  ;;  %v331_v51 = vmul.f32 %v330_v49, %v2011_v9  ;;  %v365_v58 = vmul.f32 %v364_v55, %v2009_v8 }
  0xba   : > { %355 = vrot.lane.b32.xlu2 %v351_v11, %s1848_s7  ;;  %341 = vrot.lane.b32.xlu1 %v337_v12, %s1847_s16 }
  0xbb   : > { %v333_v54 = vadd.f32 %v331_v51, %v328_v52 }
  0xbe   : > { %v2022_v13 = vld [vmem:[#allocation2 + $0x8] sm:$0xff] }
  0xbf   : > { %v2024_v14 = vld [vmem:[#allocation2 + $0x9] sm:$0xff]  ;;  %v352_v16 = vmul.f32 %v350_v5, %v2022_v13  ;;  %v338_v17 = vmul.f32 %v336_v6, %v2022_v13  ;;  %v444_v27 = vmul.f32 %v442_v26, %v2022_v13  ;;  %v458_v37 = vmul.f32 %v456_v34, %v2022_v13 }
  0xc0   : > { %v386_v18 = vmul.f32 %v384_v15, %v2024_v14  ;;  %v2032_v19 = vld [vmem:[#allocation2 + $0x2] sm:$0xff]  ;;  %v372_v23 = vmul.f32 %v370_v4, %v2024_v14  ;;  %v2041_v24 = vld [vmem:[#allocation2 + $0xa] sm:$0xff]  ;;  %v492_v36 = vmul.f32 %v490_v35, %v2024_v14  ;;  %v478_v42 = vmul.f32 %v476_v30, %v2024_v14 }
  0xc1   : > { %v419_v21 = vmul.f32 %v418_v20, %v2032_v19  ;;  %v406_v28 = vmul.f32 %v404_v25, %v2041_v24  ;;  %v405_v29 = vmul.f32 %v404_v25, %v2032_v19  ;;  %v420_v33 = vmul.f32 %v418_v20, %v2041_v24 }
  0xc2   : > { %391 = vrot.lane.b32.xlu0 %v386_v18, %s1848_s7  ;;  %357 = vrot.lane.b32.xlu2 %v352_v16, %s1848_s7  ;;  %v525_v40 = vmul.f32 %v524_v39, %v2032_v19  ;;  %v512_v44 = vmul.f32 %v510_v43, %v2041_v24  ;;  %v511_v45 = vmul.f32 %v510_v43, %v2032_v19  ;;  %v436_v18 = vstv %s2079_s8  ;;  %s1494_s8 = sld [smem:[#allocation11 + $0x10]] }
  0xc3   : > { %343 = vrot.lane.b32.xlu1 %v338_v17, %s1847_s16  ;;  %v526_v46 = vmul.f32 %v524_v39, %v2041_v24  ;;  %v332_v60 = vmul.f32 %v330_v49, %v2022_v13  ;;  %v399_v5 = vmul.f32 %v398_v63, %v2032_v19  ;;  %v366_v10 = vmul.f32 %v364_v55, %v2024_v14 }
  0xc4   : > { %v434_v25 = vstv %s2083_s9  ;;  %v504_v49 = vstv %s1476_s6  ;;  %s1492_s9 = sld [smem:[#allocation11 + $0xe]] }
  0xc5   : > { %v334_v1 = vadd.f32 %v332_v60, %v328_v52  ;;  %s1501_s6 = sld [smem:[#allocation11 + $0x14]] }
  0xca   : > { %423 = vrot.lane.b32.xlu0 %v419_v21, %s1848_s7  ;;  %389 = vrot.lane.b32.xlu2 %v385_v22, %s1848_s7  ;;  %v438_v21 = vmul.f32 %v436_v18, %v2022_v13 }
  0xcb   : > { %377 = vrot.lane.b32.xlu1 %v372_v23, %s1847_s16  ;;  %v400_v23 = vmul.f32 %v398_v63, %v2041_v24 }
  0xd2   : > { %449 = vrot.lane.b32.xlu0 %v444_v27, %s1847_s16  ;;  %411 = vrot.lane.b32.xlu2 %v406_v28, %s1847_s16  ;;  %v440_v27 = vadd.f32 %v438_v21, %v434_v25 }
  0xd3   : > { %409 = vrot.lane.b32.xlu1 %v405_v29, %s1847_s16 }
  0xda   : > { %481 = vrot.lane.b32.xlu0 %v477_v31, %s1847_s16  ;;  %447 = vrot.lane.b32.xlu2 %v443_v32, %s1847_s16 }
  0xdb   : > { %425 = vrot.lane.b32.xlu1 %v420_v33, %s1848_s7  ;;  %v470_v33 = vstv %s1473_s10  ;;  %s1495_s10 = sld [smem:[#allocation11 + $0x11]] }
  0xdc   : > { %v472_v35 = vmul.f32 %v470_v33, %v2024_v14  ;;  %v471_v14 = vmul.f32 %v470_v33, %v2009_v8 }
  0xe2   : > { %497 = vrot.lane.b32.xlu0 %v492_v36, %s1848_s7  ;;  %463 = vrot.lane.b32.xlu2 %v458_v37, %s1848_s7 }
  0xe3   : > { %461 = vrot.lane.b32.xlu1 %v457_v38, %s1848_s7 }
  0xea   : > { %529 = vrot.lane.b32.xlu0 %v525_v40, %s1848_s7  ;;  %495 = vrot.lane.b32.xlu2 %v491_v41, %s1848_s7  ;;  %v437_v40 = vmul.f32 %v436_v18, %v2011_v9 }
  0xeb   : > { %483 = vrot.lane.b32.xlu1 %v478_v42, %s1847_s16 }
  0xec   : > { %v439_v43 = vadd.f32 %v437_v40, %v434_v25 }
  0xf2   : > { %517 = vrot.lane.b32.xlu2 %v512_v44, %s1847_s16 }
  0xf3   : > { %515 = vrot.lane.b32.xlu1 %v511_v45, %s1847_s16 }
  0xfb   : > { %531 = vrot.lane.b32.xlu1 %v526_v46, %s1848_s7 }
 0x114   : > { %v356_v47 = vpop.permute.xlu2 %355 }
 0x11c   : > { %v358_v48 = vpop.permute.xlu2 %357 }
 0x124   : > { %v390_v50 = vpop.permute.xlu2 %389 }
 0x12b   : > { %v376_v53 = vpop.permute.xlu0 %375 }
 0x12c   : > { %v342_v56 = vpop.permute.xlu1 %341  ;;  %v412_v61 = vpop.permute.xlu2 %411 }
 0x12d   : > { %v347_v57 = vadd.f32 %v342_v56, %v333_v54 }
 0x12f   : > { %v361_v59 = vadd.f32 %v356_v47, %v347_v57 }
 0x131   : > { %v367_v62 = vadd.f32 %v365_v58, %v361_v59  ;;  %v506_v58 = vmul.f32 %v504_v49, %v2041_v24  ;;  %v595_v24 = vstv %s1480_s11  ;;  %s1500_s11 = sld [smem:[#allocation11 + $0x13]] }
 0x133   : > { %v381_v2 = vadd.f32 %v376_v53, %v367_v62  ;;  %v505_v53 = vmul.f32 %v504_v49, %v2032_v19  ;;  %v751_v49 = vstv %s1494_s8  ;;  %s1509_s8 = sld [smem:[#allocation11 + $0x1c]] }
 0x134   : > { %v392_v0 = vpop.permute.xlu0 %391  ;;  %v448_v15 = vpop.permute.xlu2 %447 }
 0x135   : > { %v344_v3 = vpop.permute.xlu1 %343  ;;  %v395_v6 = vadd.f32 %v390_v50, %v381_v2  ;;  %v453_v45 = vadd.f32 %v448_v15, %v439_v43  ;;  %v717_v43 = vstv %s1491_s15  ;;  %s2200_s15 = sld [smem:[#allocation11 + $0x3]] }
 0x136   : > { %v348_v4 = vadd.f32 %v344_v3, %v334_v1 }
 0x137   : > { %v401_v11 = vadd.f32 %v399_v5, %v395_v6  ;;  %v581_v5 = vstv %s1479_s27  ;;  %s1503_s27 = sld [smem:[#allocation11 + $0x16]] }
 0x138   : > { %v362_v7 = vadd.f32 %v358_v48, %v348_v4 }
 0x13a   : > { %v368_v12 = vadd.f32 %v366_v10, %v362_v7 }
 0x13c   : > { %v424_v16 = vpop.permute.xlu0 %423  ;;  %v464_v31 = vpop.permute.xlu2 %463 }
 0x13d   : > { %v378_v17 = vpop.permute.xlu1 %377 }
 0x13e   : > { %v382_v20 = vadd.f32 %v378_v17, %v368_v12  ;;  %v615_v17 = vstv %s1482_s17  ;;  %s1504_s17 = sld [smem:[#allocation11 + $0x17]] }
 0x140   : > { %v396_v22 = vadd.f32 %v392_v0, %v382_v20 }
 0x142   : > { %v402_v26 = vadd.f32 %v400_v23, %v396_v22 }
 0x144   : > { %v450_v28 = vpop.permute.xlu0 %449  ;;  %v416_v13 = vadd.f32 %v412_v61, %v402_v26  ;;  %v496_v51 = vpop.permute.xlu2 %495  ;;  %v629_v26 = vstv %s1483_s26  ;;  %s2187_s26 = sld [smem:[#allocation11]] }
 0x145   : > { %v454_v29 = vadd.f32 %v450_v28, %v440_v27  ;;  %v410_v30 = vpop.permute.xlu1 %409 }
 0x146   : > { %v415_v32 = vadd.f32 %v410_v30, %v401_v11 }
 0x147   : > { %v468_v34 = vadd.f32 %v464_v31, %v454_v29  ;;  %v663_v31 = vstv %s1486_s29  ;;  %s1507_s29 = sld [smem:[#allocation11 + $0x1a]] }
 0x148   : > { %v429_v36 = vadd.f32 %v424_v16, %v415_v32 }
 0x149   : > { %v474_v37 = vadd.f32 %v472_v35, %v468_v34 }
 0x14a   : > { %v431_v38 = vmax.f32 %v429_v36, 0.0  ;;  %v697_v36 = vstv %s1489_s13  ;;  %s2193_s13 = sld [smem:[#allocation13]] }
 0x14c   : > { %541 = vrot.lane.b32.xlu2 %v431_v38, %s1845_s24  ;;  %v482_v44 = vpop.permute.xlu0 %481  ;;  %v518_v0 = vpop.permute.xlu2 %517 }
 0x14d   : > { %v426_v39 = vpop.permute.xlu1 %425 }
 0x14e   : > { %v430_v41 = vadd.f32 %v426_v39, %v416_v13 }
 0x150   : > { %v432_v42 = vmax.f32 %v430_v41, 0.0 }
 0x152   : > { %543 = vrot.lane.b32.xlu0 %v432_v42, %s1845_s24 }
 0x154   : > { %v498_v9 = vpop.permute.xlu0 %497 }
 0x155   : > { %v462_v46 = vpop.permute.xlu1 %461 }
 0x156   : > { %v467_v47 = vadd.f32 %v462_v46, %v453_v45 }
 0x158   : > { %v473_v48 = vadd.f32 %v471_v14, %v467_v47 }
 0x15a   : > { %v487_v50 = vadd.f32 %v482_v44, %v473_v48 }
 0x15c   : > { %v501_v52 = vadd.f32 %v496_v51, %v487_v50  ;;  %v530_v62 = vpop.permute.xlu0 %529  ;;  %v731_v50 = vstv %s1492_s9  ;;  %s1522_s9 = sld [smem:[#allocation11 + $0x26]] }
 0x15d   : > { %v484_v54 = vpop.permute.xlu1 %483 }
 0x15e   : > { %v488_v55 = vadd.f32 %v484_v54, %v474_v37  ;;  %v507_v56 = vadd.f32 %v505_v53, %v501_v52  ;;  %v683_v37 = vstv %s1488_s14  ;;  %s2197_s14 = sld [smem:[#allocation11 + $0x25]] }
 0x160   : > { %v502_v57 = vadd.f32 %v498_v9, %v488_v55  ;;  %v765_v9 = vstv %s1495_s10  ;;  %s1525_s10 = sld [smem:[#allocation11 + $0x29]] }
 0x162   : > { %v508_v59 = vadd.f32 %v506_v58, %v502_v57  ;;  %v839_v57 = vstv %s1501_s6  ;;  %v825_v58 = vstv %s1500_s11  ;;  %s1524_s6 = sld [smem:[#allocation11 + $0x28]] }
 0x163   : > { %s1527_s11 = sld [smem:[#allocation11 + $0x2b]] }
 0x164   : > { %v522_v1 = vadd.f32 %v518_v0, %v508_v59 }
 0x165   : > { %v516_v60 = vpop.permute.xlu1 %515 }
 0x166   : > { %v521_v61 = vadd.f32 %v516_v60, %v507_v56 }
 0x168   : > { %v535_v8 = vadd.f32 %v530_v62, %v521_v61 }
 0x16a   : > { %v537_v63 = vmax.f32 %v535_v8, 0.0  ;;  %v859_v8 = vstv %s1503_s27  ;;  %s2237_s27 = sld [smem:[#allocation11 + $0x2c]] }
 0x16c   : > { %551 = vrot.lane.b32.xlu1 %v537_v63, %s1845_s24 }
 0x16d   : > { %v532_v2 = vpop.permute.xlu1 %531 }
 0x16e   : > { %v536_v3 = vadd.f32 %v532_v2, %v522_v1  ;;  %v873_v2 = vstv %s1504_s17  ;;  %s2240_s17 = sld [smem:[#allocation11 + $0x2e]] }
 0x170   : > { %v538_v19 = vmax.f32 %v536_v3, 0.0 }
 0x172   : > { %553 = vrot.lane.b32.xlu2 %v538_v19, %s1845_s24  ;;  %s2106_s24 = sld [smem:[#allocation11 + $0x7]] }
 0x178   : > { %v649_v25 = vstv %s2106_s24  ;;  %s1506_s24 = sld [smem:[#allocation11 + $0x19]] }
 0x17e   : > { %v893_v1 = vstv %s1506_s24  ;;  %s2248_s24 = sld [smem:[#allocation11 + $0x6]] }
 0x1a6   : > { %v542_v4 = vpop.permute.xlu2 %541 }
 0x1a7   : > { %547 = vst.msk [vmem:[#allocation3 + $0x1] sm:$0xff] %vm318_vm2, %v542_v4 }
 0x1ae   : > { %v2099_v6 = vld [vmem:[#allocation3] sm:$0xff] }
 0x1af   : > { %v596_v7 = vmul.f32 %v595_v24, %v2099_v6  ;;  %v582_v10 = vmul.f32 %v581_v5, %v2099_v6  ;;  %v2119_v22 = vld [vmem:[#allocation3 + $0x1] sm:$0xff]  ;;  %v840_v60 = vmul.f32 %v839_v57, %v2099_v6  ;;  %v826_v61 = vmul.f32 %v825_v58, %v2099_v6 }
 0x1b0   : > { %v616_v27 = vmul.f32 %v615_v17, %v2119_v22  ;;  %v630_v29 = vmul.f32 %v629_v26, %v2119_v22  ;;  %v860_v3 = vmul.f32 %v859_v8, %v2119_v22  ;;  %v874_v4 = vmul.f32 %v873_v2, %v2119_v22 }
 0x1b1   : > { %600 = vrot.lane.b32.xlu2 %v596_v7, %s1848_s7  ;;  %586 = vrot.lane.b32.xlu0 %v582_v10, %s1847_s16 }
 0x1c4   : > { %v544_v11 = vpop.permute.xlu0 %543 }
 0x1c5   : > { %548 = vst.msk [vmem:[#allocation3 + $0x9] sm:$0xff] %vm318_vm2, %v544_v11 }
 0x1cc   : > { %v554_v12 = vpop.permute.xlu2 %553  ;;  %v2108_v15 = vld [vmem:[#allocation3 + $0x8] sm:$0xff] }
 0x1cd   : > { %v2110_v16 = vld [vmem:[#allocation3 + $0x9] sm:$0xff]  ;;  %559 = vst.msk [vmem:[#allocation3 + $0x21] sm:$0xff] %vm318_vm2, %v554_v12  ;;  %v583_v18 = vmul.f32 %v581_v5, %v2108_v15  ;;  %v597_v21 = vmul.f32 %v595_v24, %v2108_v15  ;;  %v827_v62 = vmul.f32 %v825_v58, %v2108_v15  ;;  %v841_v0 = vmul.f32 %v839_v57, %v2108_v15 }
 0x1ce   : > { %v617_v20 = vmul.f32 %v615_v17, %v2110_v16  ;;  %v2121_v23 = vld [vmem:[#allocation3 + $0x2] sm:$0xff]  ;;  %v2130_v30 = vld [vmem:[#allocation3 + $0xa] sm:$0xff]  ;;  %v631_v32 = vmul.f32 %v629_v26, %v2110_v16  ;;  %v861_v63 = vmul.f32 %v859_v8, %v2110_v16  ;;  %v575_v24 = vstv %s2187_s26  ;;  %s2255_s26 = sld [smem:[#allocation11 + $0x1d]] }
 0x1cf   : > { %588 = vrot.lane.b32.xlu1 %v583_v18, %s1847_s16  ;;  %602 = vrot.lane.b32.xlu0 %v597_v21, %s1848_s7  ;;  %v650_v28 = vmul.f32 %v649_v25, %v2121_v23  ;;  %v665_v33 = vmul.f32 %v663_v31, %v2130_v30  ;;  %v651_v35 = vmul.f32 %v649_v25, %v2130_v30  ;;  %v907_v5 = vstv %s1507_s29  ;;  %s2268_s29 = sld [smem:[#allocation11 + $0x2f]] }
 0x1d0   : > { %622 = vrot.lane.b32.xlu2 %v617_v20, %s1847_s16  ;;  %v664_v38 = vmul.f32 %v663_v31, %v2121_v23  ;;  %v894_v19 = vmul.f32 %v893_v1, %v2121_v23  ;;  %v875_v7 = vmul.f32 %v873_v2, %v2110_v16  ;;  %v576_v10 = vmul.f32 %v575_v24, %v2099_v6 }
 0x1d1   : > { %v909_v11 = vmul.f32 %v907_v5, %v2130_v30  ;;  %v895_v12 = vmul.f32 %v893_v1, %v2130_v30  ;;  %v573_v17 = vstv %s2193_s13  ;;  %v609_v25 = vstv %s2200_s15  ;;  %s2271_s13 = sld [smem:[#allocation11 + $0x9]] }
 0x1d2   : > { %v578_v20 = vadd.f32 %v576_v10, %v573_v17  ;;  %v1171_v8 = vstv %s2240_s17  ;;  %s2285_s15 = sld [smem:[#allocation11 + $0x31]] }
 0x1d3   : > { %s2340_s17 = sld [smem:[#allocation11 + $0x23]] }
 0x1d4   : > { %v2149_v42 = vld [vmem:[#allocation3 + $0x21] sm:$0xff] }
 0x1d5   : > { %v719_v45 = vmul.f32 %v717_v43, %v2149_v42  ;;  %v2167_v53 = vld [vmem:[#allocation3 + $0x22] sm:$0xff]  ;;  %v733_v54 = vmul.f32 %v731_v50, %v2149_v42 }
 0x1d6   : > { %v767_v55 = vmul.f32 %v765_v9, %v2167_v53  ;;  %v753_v56 = vmul.f32 %v751_v49, %v2167_v53 }
 0x1d7   : > { %620 = vrot.lane.b32.xlu1 %v616_v27, %s1847_s16  ;;  %634 = vrot.lane.b32.xlu0 %v630_v29, %s1848_s7  ;;  %v1069_v27 = vstv %s2197_s14  ;;  %v908_v29 = vmul.f32 %v907_v5, %v2121_v23  ;;  %s2273_s14 = sld [smem:[#allocation11 + $0x1f]] }
 0x1d8   : > { %654 = vrot.lane.b32.xlu2 %v650_v28, %s1847_s16  ;;  %v927_v28 = vstv %s1509_s8  ;;  %s2293_s8 = sld [smem:[#allocation11 + $0xc]] }
 0x1de   : > { %v552_v34 = vpop.permute.xlu1 %551 }
 0x1df   : > { %558 = vst.msk [vmem:[#allocation3 + $0x19] sm:$0xff] %vm318_vm2, %v552_v34  ;;  %636 = vrot.lane.b32.xlu1 %v631_v32, %s1848_s7  ;;  %656 = vrot.lane.b32.xlu0 %v651_v35, %s1847_s16  ;;  %v610_v32 = vmul.f32 %v609_v25, %v2119_v22 }
 0x1e0   : > { %670 = vrot.lane.b32.xlu2 %v665_v33, %s1848_s7  ;;  %v1070_v33 = vmul.f32 %v1069_v27, %v2099_v6 }
 0x1e6   : > { %v2140_v13 = vld [vmem:[#allocation3 + $0x18] sm:$0xff]  ;;  %v2147_v41 = vld [vmem:[#allocation3 + $0x20] sm:$0xff] }
 0x1e7   : > { %668 = vrot.lane.b32.xlu1 %v664_v38, %s1848_s7  ;;  %v698_v39 = vmul.f32 %v697_v36, %v2140_v13  ;;  %v684_v40 = vmul.f32 %v683_v37, %v2140_v13  ;;  %v685_v44 = vmul.f32 %v683_v37, %v2147_v41  ;;  %v699_v46 = vmul.f32 %v697_v36, %v2147_v41  ;;  %v2157_v14 = vld [vmem:[#allocation3 + $0x19] sm:$0xff] }
 0x1e8   : > { %v2159_v47 = vld [vmem:[#allocation3 + $0x1a] sm:$0xff]  ;;  %v718_v48 = vmul.f32 %v717_v43, %v2157_v14  ;;  %v732_v52 = vmul.f32 %v731_v50, %v2157_v14  ;;  %v928_v34 = vmul.f32 %v927_v28, %v2140_v13  ;;  %v929_v37 = vmul.f32 %v927_v28, %v2147_v41 }
 0x1e9   : > { %702 = vrot.lane.b32.xlu2 %v698_v39, %s1848_s7  ;;  %688 = vrot.lane.b32.xlu0 %v684_v40, %s1847_s16  ;;  %v752_v51 = vmul.f32 %v751_v49, %v2159_v47  ;;  %v766_v59 = vmul.f32 %v765_v9, %v2159_v47  ;;  %v1083_v38 = vstv %s1522_s9  ;;  %v1071_v40 = vmul.f32 %v1069_v27, %v2108_v15  ;;  %s2305_s9 = sld [smem:[#allocation11 + $0x32]] }
 0x1ea   : > { %v1085_v39 = vmul.f32 %v1083_v38, %v2108_v15  ;;  %v1172_v2 = vmul.f32 %v1171_v8, %v2140_v13 }
 0x1ef   : > { %690 = vrot.lane.b32.xlu1 %v685_v44, %s1847_s16  ;;  %v1117_v44 = vstv %s1525_s10  ;;  %s2307_s10 = sld [smem:[#allocation11 + $0x20]] }
 0x1f1   : > { %724 = vrot.lane.b32.xlu2 %v719_v45, %s1847_s16  ;;  %704 = vrot.lane.b32.xlu0 %v699_v46, %s1848_s7  ;;  %v1103_v45 = vstv %s1524_s6  ;;  %v1084_v46 = vmul.f32 %v1083_v38, %v2099_v6  ;;  %s2319_s6 = sld [smem:[#allocation11 + $0xf]] }
 0x1f2   : > { %v1104_v49 = vmul.f32 %v1103_v45, %v2119_v22  ;;  %v1105_v9 = vmul.f32 %v1103_v45, %v2110_v16 }
 0x1f7   : > { %722 = vrot.lane.b32.xlu1 %v718_v48, %s1847_s16  ;;  %v1118_v48 = vmul.f32 %v1117_v44, %v2119_v22 }
 0x1f9   : > { %756 = vrot.lane.b32.xlu2 %v752_v51, %s1847_s16  ;;  %736 = vrot.lane.b32.xlu0 %v732_v52, %s1848_s7  ;;  %v577_v51 = vmul.f32 %v575_v24, %v2108_v15  ;;  %v1137_v52 = vstv %s1527_s11  ;;  %s2322_s11 = sld [smem:[#allocation11 + $0x22]] }
 0x1ff   : > { %738 = vrot.lane.b32.xlu1 %v733_v54, %s1848_s7  ;;  %v1139_v54 = vmul.f32 %v1137_v52, %v2130_v30 }
 0x201   : > { %772 = vrot.lane.b32.xlu2 %v767_v55, %s1848_s7  ;;  %758 = vrot.lane.b32.xlu0 %v753_v56, %s1847_s16  ;;  %v1119_v55 = vmul.f32 %v1117_v44, %v2110_v16  ;;  %v579_v56 = vadd.f32 %v577_v51, %v573_v17 }
 0x207   : > { %770 = vrot.lane.b32.xlu1 %v766_v59, %s1848_s7 }
 0x209   : > { %844 = vrot.lane.b32.xlu2 %v840_v60, %s1848_s7  ;;  %830 = vrot.lane.b32.xlu0 %v826_v61, %s1847_s16  ;;  %v611_v61 = vmul.f32 %v609_v25, %v2110_v16 }
 0x20b   : > { %v601_v18 = vpop.permute.xlu2 %600 }
 0x20f   : > { %832 = vrot.lane.b32.xlu1 %v827_v62, %s1847_s16 }
 0x211   : > { %866 = vrot.lane.b32.xlu2 %v861_v63, %s1847_s16  ;;  %846 = vrot.lane.b32.xlu0 %v841_v0, %s1848_s7  ;;  %v1151_v63 = vstv %s2237_s27  ;;  %v1138_v0 = vmul.f32 %v1137_v52, %v2121_v23  ;;  %s2335_s27 = sld [smem:[#allocation11 + $0x12]] }
 0x212   : > { %v1153_v17 = vmul.f32 %v1151_v63, %v2130_v30 }
 0x217   : > { %864 = vrot.lane.b32.xlu1 %v860_v3, %s1847_s16  ;;  %v1152_v3 = vmul.f32 %v1151_v63, %v2121_v23 }
 0x219   : > { %898 = vrot.lane.b32.xlu2 %v894_v19, %s1847_s16  ;;  %878 = vrot.lane.b32.xlu0 %v874_v4, %s1848_s7  ;;  %v643_v4 = vstv %s2248_s24  ;;  %s2342_s24 = sld [smem:[#allocation11 + $0x34]] }
 0x21a   : > { %v644_v10 = vmul.f32 %v643_v4, %v2121_v23  ;;  %v645_v28 = vmul.f32 %v643_v4, %v2130_v30  ;;  %v1219_v4 = vstv %s2305_s9  ;;  %s1519_s9 = sld [smem:[#allocation13 + $0x2]] }
 0x21f   : > { %880 = vrot.lane.b32.xlu1 %v875_v7, %s1848_s7 }
 0x221   : > { %914 = vrot.lane.b32.xlu2 %v909_v11, %s1848_s7  ;;  %900 = vrot.lane.b32.xlu0 %v895_v12, %s1847_s16  ;;  %v941_v12 = vstv %s2255_s26  ;;  %s2347_s26 = sld [smem:[#allocation13 + $0x1]] }
 0x223   : > { %v587_v21 = vpop.permute.xlu0 %586 }
 0x224   : > { %v592_v26 = vadd.f32 %v587_v21, %v578_v20  ;;  %v943_v20 = vmul.f32 %v941_v12, %v2147_v41  ;;  %v1173_v21 = vmul.f32 %v1171_v8, %v2147_v41 }
 0x226   : > { %v606_v31 = vadd.f32 %v601_v18, %v592_v26 }
 0x227   : > { %912 = vrot.lane.b32.xlu1 %v908_v29, %s1848_s7 }
 0x228   : > { %v612_v35 = vadd.f32 %v610_v32, %v606_v31 }
 0x229   : > { %1074 = vrot.lane.b32.xlu2 %v1070_v33, %s1847_s16  ;;  %932 = vrot.lane.b32.xlu0 %v928_v34, %s1847_s16  ;;  %v1185_v33 = vstv %s2268_s29  ;;  %v942_v34 = vmul.f32 %v941_v12, %v2140_v13  ;;  %s2353_s29 = sld [smem:[#allocation11 + $0x15]] }
 0x22a   : > { %v2219_v36 = vpop.permute.xlu2 %622 }
 0x22f   : > { %934 = vrot.lane.b32.xlu1 %v929_v37, %s1847_s16 }
 0x231   : > { %1090 = vrot.lane.b32.xlu2 %v1085_v39, %s1848_s7  ;;  %1076 = vrot.lane.b32.xlu0 %v1071_v40, %s1847_s16  ;;  %v1186_v39 = vmul.f32 %v1185_v33, %v2140_v13 }
 0x232   : > { %v2227_v43 = vpop.permute.xlu2 %654 }
 0x237   : > { %1088 = vrot.lane.b32.xlu1 %v1084_v46, %s1848_s7 }
 0x239   : > { %1122 = vrot.lane.b32.xlu2 %v1118_v48, %s1848_s7  ;;  %1108 = vrot.lane.b32.xlu0 %v1104_v49, %s1847_s16 }
 0x23a   : > { %v2235_v50 = vpop.permute.xlu2 %670 }
 0x23f   : > { %1110 = vrot.lane.b32.xlu1 %v1105_v9, %s1847_s16 }
 0x241   : > { %v589_v57 = vpop.permute.xlu1 %588  ;;  %1144 = vrot.lane.b32.xlu2 %v1139_v54, %s1847_s16  ;;  %1124 = vrot.lane.b32.xlu0 %v1119_v55, %s1848_s7  ;;  %v603_v59 = vpop.permute.xlu0 %602  ;;  %v1205_v55 = vstv %s2285_s15  ;;  %s1520_s15 = sld [smem:[#allocation11 + $0x24]] }
 0x242   : > { %v593_v58 = vadd.f32 %v589_v57, %v579_v56  ;;  %v1207_v56 = vmul.f32 %v1205_v55, %v2149_v42 }
 0x243   : > { %v2250_v60 = vpop.permute.xlu2 %702 }
 0x244   : > { %v607_v62 = vadd.f32 %v603_v59, %v593_v58  ;;  %v711_v58 = vstv %s2293_s8 }
 0x246   : > { %v613_v1 = vadd.f32 %v611_v61, %v607_v62  ;;  %v712_v61 = vmul.f32 %v711_v58, %v2157_v14 }
 0x247   : > { %1142 = vrot.lane.b32.xlu1 %v1138_v0, %s1847_s16 }
 0x248   : > { %v627_v25 = vadd.f32 %v2219_v36, %v613_v1  ;;  %v961_v36 = vstv %s2273_s14  ;;  %s2385_s14 = sld [smem:[#allocation11 + $0x18]] }
 0x249   : > { %v621_v19 = vpop.permute.xlu1 %620  ;;  %1176 = vrot.lane.b32.xlu2 %v1172_v2, %s1847_s16  ;;  %1156 = vrot.lane.b32.xlu0 %v1152_v3, %s1848_s7  ;;  %v635_v5 = vpop.permute.xlu0 %634  ;;  %v962_v38 = vmul.f32 %v961_v36, %v2157_v14  ;;  %v963_v57 = vmul.f32 %v961_v36, %v2149_v42  ;;  %v713_v2 = vmul.f32 %v711_v58, %v2149_v42 }
 0x24a   : > { %v626_v24 = vadd.f32 %v621_v19, %v612_v35  ;;  %v677_v35 = vstv %s2271_s13  ;;  %s2358_s13 = sld [smem:[#allocation11 + $0x35]] }
 0x24b   : > { %v2264_v7 = vpop.permute.xlu2 %724  ;;  %v679_v45 = vmul.f32 %v677_v35, %v2147_v41  ;;  %v678_v49 = vmul.f32 %v677_v35, %v2140_v13 }
 0x24c   : > { %v640_v11 = vadd.f32 %v635_v5, %v626_v24  ;;  %v975_v24 = vstv %s2307_s10  ;;  %v1220_v5 = vmul.f32 %v1219_v4, %v2157_v14  ;;  %s1523_s10 = sld [smem:[#allocation11 + $0x27]] }
 0x24e   : > { %v646_v18 = vadd.f32 %v644_v10, %v640_v11  ;;  %v976_v10 = vmul.f32 %v975_v24, %v2157_v14 }
 0x24f   : > { %1158 = vrot.lane.b32.xlu1 %v1153_v17, %s1848_s7  ;;  %v745_v17 = vstv %s2319_s6  ;;  %s2415_s6 = sld [smem:[#allocation11 + $0x1e]] }
 0x250   : > { %v660_v44 = vadd.f32 %v2227_v43, %v646_v18 }
 0x251   : > { %v637_v26 = vpop.permute.xlu1 %636  ;;  %948 = vrot.lane.b32.xlu2 %v943_v20, %s1848_s7  ;;  %1178 = vrot.lane.b32.xlu0 %v1173_v21, %s1847_s16  ;;  %v657_v29 = vpop.permute.xlu0 %656  ;;  %v746_v21 = vmul.f32 %v745_v17, %v2159_v47 }
 0x252   : > { %v641_v27 = vadd.f32 %v637_v26, %v627_v25  ;;  %v995_v26 = vstv %s2322_s11  ;;  %s1526_s11 = sld [smem:[#allocation11 + $0x2a]] }
 0x253   : > { %v2282_v31 = vpop.permute.xlu2 %756 }
 0x254   : > { %v647_v32 = vadd.f32 %v645_v28, %v641_v27  ;;  %v977_v27 = vmul.f32 %v975_v24, %v2149_v42 }
 0x256   : > { %v661_v37 = vadd.f32 %v657_v29, %v647_v32  ;;  %v997_v29 = vmul.f32 %v995_v26, %v2167_v53  ;;  %v1221_v32 = vmul.f32 %v1219_v4, %v2149_v42 }
 0x257   : > { %946 = vrot.lane.b32.xlu1 %v942_v34, %s1848_s7 }
 0x258   : > { %v675_v40 = vadd.f32 %v2235_v50, %v661_v37  ;;  %v1187_v50 = vmul.f32 %v1185_v33, %v2147_v41  ;;  %v747_v37 = vmul.f32 %v745_v17, %v2167_v53 }
 0x259   : > { %v669_v46 = vpop.permute.xlu1 %668  ;;  %966 = vrot.lane.b32.xlu2 %v962_v38, %s1847_s16  ;;  %1190 = vrot.lane.b32.xlu0 %v1186_v39, %s1848_s7  ;;  %v819_v39 = vstv %s2335_s27  ;;  %s1529_s27 = sld [smem:[#allocation11 + $0x2d]] }
 0x25a   : > { %v674_v48 = vadd.f32 %v669_v46, %v660_v44  ;;  %v681_v51 = vadd.f32 %v679_v45, %v675_v40  ;;  %v1009_v45 = vstv %s2340_s17  ;;  %v1239_v46 = vstv %s2342_s24  ;;  %s1532_s17 = sld [smem:[#allocation11 + $0x30]] }
 0x25b   : > { %v689_v52 = vpop.permute.xlu0 %688  ;;  %v2301_v9 = vpop.permute.xlu2 %772  ;;  %s1514_s24 = sld [smem:[#allocation11 + $0x21]] }
 0x25c   : > { %v680_v54 = vadd.f32 %v678_v49, %v674_v48  ;;  %v820_v48 = vmul.f32 %v819_v39, %v2099_v6  ;;  %v1010_v49 = vmul.f32 %v1009_v45, %v2159_v47 }
 0x25e   : > { %v694_v43 = vadd.f32 %v689_v52, %v680_v54  ;;  %v817_v52 = vstv %s2347_s26  ;;  %s1535_s26 = sld [smem:[#allocation11 + $0x33]] }
 0x25f   : > { %1192 = vrot.lane.b32.xlu1 %v1187_v50, %s1848_s7 }
 0x260   : > { %v708_v59 = vadd.f32 %v2250_v60, %v694_v43  ;;  %v1206_v60 = vmul.f32 %v1205_v55, %v2157_v14 }
 0x261   : > { %1212 = vrot.lane.b32.xlu2 %v1207_v56, %s1847_s16  ;;  %968 = vrot.lane.b32.xlu0 %v963_v57, %s1847_s16  ;;  %v691_v62 = vpop.permute.xlu1 %690  ;;  %v822_v57 = vadd.f32 %v820_v48, %v817_v52 }
 0x262   : > { %v695_v8 = vadd.f32 %v691_v62, %v681_v51  ;;  %v714_v63 = vadd.f32 %v712_v61, %v708_v59  ;;  %v1240_v51 = vmul.f32 %v1239_v46, %v2159_v47  ;;  %v1253_v61 = vstv %s2358_s13 }
 0x263   : > { %v705_v0 = vpop.permute.xlu0 %704  ;;  %v2317_v1 = vpop.permute.xlu2 %844  ;;  %v853_v62 = vstv %s2353_s29  ;;  %s1549_s29 = smul.u32 48, %s1902_s22 }
 0x264   : > { %v709_v3 = vadd.f32 %v705_v0, %v695_v8 }
 0x265   : > { %s1325_s22 = scalar_lea.hbm %s2482_s5, %s1549_s29 }
 0x266   : > { %v715_v19 = vadd.f32 %v713_v2, %v709_v3  ;;  %v854_v2 = vmul.f32 %v853_v62, %v2119_v22  ;;  %v1255_v3 = vmul.f32 %v1253_v61, %v2167_v53 }
 0x267   : > { %1210 = vrot.lane.b32.xlu1 %v1206_v60, %s1847_s16  ;;  %v1011_v60 = vmul.f32 %v1009_v45, %v2167_v53 }
 0x268   : > { %v729_v33 = vadd.f32 %v2264_v7, %v715_v19  ;;  %v996_v7 = vmul.f32 %v995_v26, %v2159_v47 }
 0x269   : > { %1224 = vrot.lane.b32.xlu2 %v1220_v5, %s1848_s7  ;;  %980 = vrot.lane.b32.xlu0 %v976_v10, %s1848_s7  ;;  %v723_v11 = vpop.permute.xlu1 %722 }
 0x26a   : > { %v728_v12 = vadd.f32 %v723_v11, %v714_v63 }
 0x26b   : > { %v737_v18 = vpop.permute.xlu0 %736  ;;  %v2333_v20 = vpop.permute.xlu2 %866 }
 0x26c   : > { %v742_v25 = vadd.f32 %v737_v18, %v728_v12  ;;  %v855_v18 = vmul.f32 %v853_v62, %v2110_v16 }
 0x26e   : > { %v748_v28 = vadd.f32 %v746_v21, %v742_v25  ;;  %v1254_v25 = vmul.f32 %v1253_v61, %v2159_v47 }
 0x26f   : > { %982 = vrot.lane.b32.xlu1 %v977_v27, %s1848_s7 }
 0x270   : > { %v762_v55 = vadd.f32 %v2282_v31, %v748_v28  ;;  %v1241_v31 = vmul.f32 %v1239_v46, %v2167_v53 }
 0x271   : > { %1002 = vrot.lane.b32.xlu2 %v997_v29, %s1847_s16  ;;  %1226 = vrot.lane.b32.xlu0 %v1221_v32, %s1848_s7  ;;  %v739_v34 = vpop.permute.xlu1 %738  ;;  %v887_v29 = vstv %s2385_s14 }
 0x272   : > { %v743_v35 = vadd.f32 %v739_v34, %v729_v33 }
 0x273   : > { %v759_v36 = vpop.permute.xlu0 %758  ;;  %v2355_v38 = vpop.permute.xlu2 %898 }
 0x274   : > { %v749_v40 = vadd.f32 %v747_v37, %v743_v35 }
 0x276   : > { %v763_v44 = vadd.f32 %v759_v36, %v749_v40 }
 0x277   : > { %1000 = vrot.lane.b32.xlu1 %v996_v7, %s1847_s16 }
 0x278   : > { %v777_v54 = vadd.f32 %v2301_v9, %v763_v44  ;;  %v821_v9 = vmul.f32 %v819_v39, %v2108_v15  ;;  %v888_v39 = vmul.f32 %v887_v29, %v2121_v23 }
 0x279   : > { %1014 = vrot.lane.b32.xlu2 %v1010_v49, %s1848_s7  ;;  %1244 = vrot.lane.b32.xlu0 %v1240_v51, %s1847_s16  ;;  %v771_v50 = vpop.permute.xlu1 %770 }
 0x27a   : > { %v1497_v43 = vmul.f32 -1.442695, %v777_v54  ;;  %v776_v56 = vadd.f32 %v771_v50, %v762_v55  ;;  %v823_v19 = vadd.f32 %v821_v9, %v817_v52  ;;  %v889_v55 = vmul.f32 %v887_v29, %v2130_v30 }
 0x27b   : > { %v831_v58 = vpop.permute.xlu0 %830  ;;  %v2372_v59 = vpop.permute.xlu2 %914 }
 0x27c   : > { %1645 = vpow2.f32 %v1497_v43  ;;  %v1496_v8 = vmul.f32 -1.442695, %v776_v56  ;;  %v836_v63 = vadd.f32 %v831_v58, %v822_v57 }
 0x27e   : > { %1647 = vpow2.f32 %v1496_v8  ;;  %v850_v0 = vadd.f32 %v2317_v1, %v836_v63 }
 0x27f   : > { %1246 = vrot.lane.b32.xlu1 %v1241_v31, %s1847_s16  ;;  %s2397_s16 = sld [smem:[#allocation11 + $0x1b]] }
 0x280   : > { %v856_v4 = vadd.f32 %v854_v2, %v850_v0 }
 0x281   : > { %1260 = vrot.lane.b32.xlu2 %v1255_v3, %s1848_s7  ;;  %1016 = vrot.lane.b32.xlu0 %v1011_v60, %s1848_s7  ;;  %v833_v24 = vpop.permute.xlu1 %832 }
 0x282   : > { %v1646_v5 = vpop.eup %1645  ;;  %v837_v1 = vadd.f32 %v833_v24, %v823_v19 }
 0x283   : > { %v785_v10 = vadd.f32 1.0, %v1646_v5  ;;  %v847_v11 = vpop.permute.xlu0 %846  ;;  %v2387_v12 = vpop.permute.xlu2 %1074 }
 0x284   : > { %v1648_v17 = vpop.eup %1647  ;;  %v851_v21 = vadd.f32 %v847_v11, %v837_v1 }
 0x285   : > { %1649 = vrcp.f32 %v785_v10  ;;  %v784_v26 = vadd.f32 1.0, %v1648_v17  ;;  %v812_v46 = vand.u32 2147483648, %v785_v10  ;;  %vm806_vm5 = vweird.f32 %v785_v10 }
 0x286   : > { %v857_v27 = vadd.f32 %v855_v18, %v851_v21  ;;  %v921_v0 = vstv %s2397_s16 }
 0x287   : > { %1258 = vrot.lane.b32.xlu1 %v1254_v25, %s1848_s7  ;;  %1651 = vrcp.f32 %v784_v26  ;;  %s1548_s7 = smul.u32 48, %s1983_s12  ;;  %v797_v43 = vand.u32 2147483648, %v784_v26  ;;  %v813_v57 = vor.u32 1.1754944e-38, %v812_v46  ;;  %v795_v61 = vand.u32 2147483647, %v784_v26 }
 0x288   : > { %v871_v32 = vadd.f32 %v2333_v20, %v857_v27  ;;  %v810_v20 = vand.u32 2147483647, %v785_v10  ;;  %vm791_vm9 = vweird.f32 %v784_v26  ;;  %v923_v24 = vmul.f32 %v921_v0, %v2147_v41 }
 0x289   : > { %v865_v28 = vpop.permute.xlu1 %864  ;;  %s2405_s8 = scalar_lea.vmem [#allocation14], %s1548_s7  ;;  %v798_v2 = vor.u32 1.1754944e-38, %v797_v43  ;;  %vm796_vm11 = vcmp.eq.f32.partialorder %v795_v61, 8.507059e+37  ;;  %v1063_v25 = vstv %s1520_s15  ;;  %v1061_v27 = vstv %s1519_s9  ;;  %s1328_s7 = sshll.u32 %s1325_s22, 4  ;;  %s1329_s7 = int_to_ptr.hbm [resolvable:$true] %s1328_s7 }
 0x28a   : > { %v870_v33 = vadd.f32 %v865_v28, %v856_v4  ;;  %vm811_vm8 = vcmp.eq.f32.partialorder %v810_v20, 8.507059e+37  ;;  %v955_v46 = vstv %s2415_s6  ;;  %s1326_s16 = sshll.u32 %s2405_s8, 4  ;;  %s1314_s15 = scalar_lea.sflag [#allocation6], %s1983_s12  ;;  %s1327_s16 = int_to_ptr.vmem [resolvable:$true] %s1326_s16 }
 0x28b   : > { %v1650_v34 = vpop.eup %1649  ;;  %v879_v35 = vpop.permute.xlu0 %878  ;;  %s1773_s9 = sshra.s32 %s1329_s7, 4  ;;  %s1774_s9 = int_to_ptr.hbm [resolvable:$true] %s1773_s9 }
 0x28c   : > { %v2394_v37 = vpop.permute.xlu2 %1090  ;;  %v802_v36 = vmul.f32 %v1650_v34, %v785_v10  ;;  %v884_v40 = vadd.f32 %v879_v35, %v870_v33  ;;  %vm807_vm3 = vweird.f32 %v1650_v34  ;;  %v922_v10 = vmul.f32 %v921_v0, %v2140_v13  ;;  %p1780_p9 = scmp.lt.s32.totalorder %s1774_s9, %s2482_s5 }
 0x28d   : > { %v1652_v7 = vpop.eup %1651  ;;  %vm808_vm6 = vmor %vm806_vm5, %vm807_vm3 }
 0x28e   : > { %v803_v44 = vsub.f32 1.0, %v802_v36  ;;  %v890_v45 = vadd.f32 %v888_v39, %v884_v40  ;;  %v787_v48 = vmul.f32 %v1652_v7, %v784_v26  ;;  %vm792_vm7 = vweird.f32 %v1652_v7 }
 0x28f   : > { %vm793_vm10 = vmor %vm791_vm9, %vm792_vm7  ;;  %v1065_v26 = vmul.f32 %v1063_v25, %v2108_v15  ;;  %v1097_v36 = vstv %s1523_s10  ;;  %s1775_s10 = scalar_lea.hbm %s1774_s9, 48 }
 0x290   : > { %v804_v49 = vmul.f32 %v1650_v34, %v803_v44  ;;  %v904_v51 = vadd.f32 %v2355_v38, %v890_v45  ;;  %v788_v52 = vsub.f32 1.0, %v787_v48  ;;  %p1776_p1 = scmp.ne.s32.totalorder %s1774_s9, %s1775_s10 }
 0x291   : > { %v881_v54 = vpop.permute.xlu1 %880 }
 0x292   : > { %v805_v50 = vadd.f32 %v1650_v34, %v804_v49  ;;  %v885_v56 = vadd.f32 %v881_v54, %v871_v32  ;;  %v789_v58 = vmul.f32 %v1652_v7, %v788_v52  ;;  %v1067_v32 = vadd.f32 %v1065_v26, %v1061_v27  ;;  %p1777_p4 = pnand %p1776_p1, %p1956_p5 }
 0x293   : > { %v901_v62 = vpop.permute.xlu0 %900  ;;  %v957_v54 = vmul.f32 %v955_v46, %v2149_v42 }
 0x294   : > { %v1123_v8 = vpop.permute.xlu2 %1122  ;;  %v809_v63 = vsel %vm808_vm6, %v1650_v34, %v805_v50  ;;  %v891_v38 = vadd.f32 %v889_v55, %v885_v56  ;;  %v790_v31 = vadd.f32 %v1652_v7, %v789_v58  ;;  %v1131_v55 = vstv %s1526_s11  ;;  %p1778_p8 = pneg %p1777_p4 }
 0x295   : > { %v814_v9 = vsel %vm811_vm8, %v813_v57, %v809_v63  ;;  %v1133_v61 = vmul.f32 %v1131_v55, %v2130_v30 }
 0x296   : > { %1306 = vst.msk [vmem:[%s2405_s8 + $0x8] sm:$0xff] %vm1304_vm4, %v814_v9  ;;  %v905_v3 = vadd.f32 %v901_v62, %v891_v38  ;;  %v794_v60 = vsel %vm793_vm10, %v1652_v7, %v790_v31  ;;  %v1099_v7 = vmul.f32 %v1097_v36, %v2110_v16  ;;  %v1132_v16 = vmul.f32 %v1131_v55, %v2121_v23 }
 0x297   : > { %v799_v19 = vsel %vm796_vm11, %v798_v2, %v794_v60  ;;  %v1165_v38 = vstv %s1529_s27  ;;  %s1779_s27 = scalar_lea.hbm %s2482_s5, 96 }
 0x298   : > { %v919_v4 = vadd.f32 %v2372_v59, %v905_v3  ;;  %1305 = vst.msk [vmem:[%s2405_s8] sm:$0xff] %vm1304_vm4, %v799_v19  ;;  %v1064_v59 = vmul.f32 %v1063_v25, %v2099_v6  ;;  %v1098_v6 = vmul.f32 %v1097_v36, %v2119_v22  ;;  %v1166_v0 = vmul.f32 %v1165_v38, %v2140_v13  ;;  %p1781_p10 = scmp.lt.s32.totalorder %s1779_s27, %s1775_s10 }
 0x299   : > { %v913_v5 = vpop.permute.xlu1 %912  ;;  %v1199_v13 = vstv %s1532_s17 }
 0x29a   : > { %v918_v1 = vadd.f32 %v913_v5, %v904_v51  ;;  %v925_v11 = vadd.f32 %v923_v24, %v919_v4  ;;  %v1066_v39 = vadd.f32 %v1064_v59, %v1061_v27  ;;  %v1167_v4 = vmul.f32 %v1165_v38, %v2147_v41  ;;  %p1782_p2 = por %p1781_p10, %p1780_p9 }
 0x29b   : > { %v933_v17 = vpop.permute.xlu0 %932  ;;  %v1201_v41 = vmul.f32 %v1199_v13, %v2149_v42 }
 0x29c   : > { %v1145_v18 = vpop.permute.xlu2 %1144  ;;  %v924_v21 = vadd.f32 %v922_v10, %v918_v1  ;;  %v1080_v15 = vadd.f32 %v2387_v12, %v1066_v39  ;;  %v956_v10 = vmul.f32 %v955_v46, %v2157_v14  ;;  %p1783_p11 = pnand %p1782_p2, %p1778_p8 }
 0x29e   : > { %v938_v30 = vadd.f32 %v933_v17, %v924_v21 }
 0x2a1   : > { %v935_v28 = vpop.permute.xlu1 %934 }
 0x2a2   : > { %v939_v29 = vadd.f32 %v935_v28, %v925_v11 }
 0x2a3   : > { %v1077_v33 = vpop.permute.xlu0 %1076 }
 0x2a4   : > { %v1177_v34 = vpop.permute.xlu2 %1176  ;;  %v1081_v35 = vadd.f32 %v1077_v33, %v1067_v32 }
 0x2a6   : > { %v1095_v40 = vadd.f32 %v2394_v37, %v1081_v35 }
 0x2a8   : > { %v1101_v44 = vadd.f32 %v1099_v7, %v1095_v40 }
 0x2a9   : > { %v1089_v45 = vpop.permute.xlu1 %1088 }
 0x2aa   : > { %v1094_v48 = vadd.f32 %v1089_v45, %v1080_v15  ;;  %v989_v15 = vstv %s1514_s24 }
 0x2ab   : > { %v1109_v49 = vpop.permute.xlu0 %1108 }
 0x2ac   : > { %v949_v20 = vpop.permute.xlu2 %948  ;;  %v1100_v51 = vadd.f32 %v1098_v6, %v1094_v48 }
 0x2ad   : > { %v953_v52 = vadd.f32 %v949_v20, %v939_v29 }
 0x2ae   : > { %v1114_v50 = vadd.f32 %v1109_v49, %v1100_v51 }
 0x2af   : > { %v959_v43 = vadd.f32 %v957_v54, %v953_v52  ;;  %v991_v52 = vmul.f32 %v989_v15, %v2167_v53 }
 0x2b0   : > { %v1128_v37 = vadd.f32 %v1123_v8, %v1114_v50 }
 0x2b1   : > { %v1111_v56 = vpop.permute.xlu1 %1110 }
 0x2b2   : > { %v1115_v12 = vadd.f32 %v1111_v56, %v1101_v44  ;;  %v1134_v57 = vadd.f32 %v1132_v16, %v1128_v37  ;;  %v1233_v44 = vstv %s1535_s26 }
 0x2b3   : > { %v1125_v58 = vpop.permute.xlu0 %1124  ;;  %v1234_v48 = vmul.f32 %v1233_v44, %v2159_v47  ;;  %v1235_v56 = vmul.f32 %v1233_v44, %v2167_v53 }
 0x2b4   : > { %v1129_v22 = vadd.f32 %v1125_v58, %v1115_v12  ;;  %v967_v60 = vpop.permute.xlu2 %966 }
 0x2b6   : > { %v1135_v62 = vadd.f32 %v1133_v61, %v1129_v22 }
 0x2b8   : > { %v1149_v8 = vadd.f32 %v1145_v18, %v1135_v62  ;;  %v1200_v18 = vmul.f32 %v1199_v13, %v2157_v14  ;;  %v990_v14 = vmul.f32 %v989_v15, %v2159_v47 }
 0x2b9   : > { %v1143_v63 = vpop.permute.xlu1 %1142 }
 0x2ba   : > { %v1148_v9 = vadd.f32 %v1143_v63, %v1134_v57 }
 0x2bb   : > { %v1157_v31 = vpop.permute.xlu0 %1156 }
 0x2bc   : > { %v1162_v2 = vadd.f32 %v1157_v31, %v1148_v9  ;;  %v1213_v26 = vpop.permute.xlu2 %1212 }
 0x2be   : > { %v1168_v3 = vadd.f32 %v1166_v0, %v1162_v2 }
 0x2c0   : > { %v1182_v25 = vadd.f32 %v1177_v34, %v1168_v3 }
 0x2c1   : > { %v1159_v23 = vpop.permute.xlu1 %1158 }
 0x2c2   : > { %v1163_v19 = vadd.f32 %v1159_v23, %v1149_v8 }
 0x2c3   : > { %v1179_v24 = vpop.permute.xlu0 %1178 }
 0x2c4   : > { %v1169_v5 = vadd.f32 %v1167_v4, %v1163_v19  ;;  %v1225_v36 = vpop.permute.xlu2 %1224 }
 0x2c6   : > { %v1183_v32 = vadd.f32 %v1179_v24, %v1169_v5 }
 0x2c9   : > { %v947_v1 = vpop.permute.xlu1 %946 }
 0x2ca   : > { %v952_v11 = vadd.f32 %v947_v1, %v938_v30 }
 0x2cb   : > { %v1191_v27 = vpop.permute.xlu0 %1190 }
 0x2cc   : > { %v958_v28 = vadd.f32 %v956_v10, %v952_v11  ;;  %v1196_v59 = vadd.f32 %v1191_v27, %v1182_v25  ;;  %v1003_v49 = vpop.permute.xlu2 %1002 }
 0x2ce   : > { %v1202_v29 = vadd.f32 %v1200_v18, %v1196_v59  ;;  %v972_v40 = vadd.f32 %v967_v60, %v958_v28 }
 0x2d1   : > { %v1193_v33 = vpop.permute.xlu1 %1192 }
 0x2d2   : > { %v1197_v35 = vadd.f32 %v1193_v33, %v1183_v32 }
 0x2d3   : > { %v969_v17 = vpop.permute.xlu0 %968 }
 0x2d4   : > { %v1203_v21 = vadd.f32 %v1201_v41, %v1197_v35  ;;  %v973_v20 = vadd.f32 %v969_v17, %v959_v43  ;;  %v1015_v57 = vpop.permute.xlu2 %1014 }
 0x2d6   : > { %v1217_v55 = vadd.f32 %v1213_v26, %v1203_v21 }
 0x2d9   : > { %v1211_v39 = vpop.permute.xlu1 %1210 }
 0x2da   : > { %v1216_v34 = vadd.f32 %v1211_v39, %v1202_v29 }
 0x2db   : > { %v981_v7 = vpop.permute.xlu0 %980 }
 0x2dc   : > { %v1230_v45 = vadd.f32 %v1225_v36, %v1216_v34  ;;  %v986_v46 = vadd.f32 %v981_v7, %v972_v40  ;;  %v1261_v9 = vpop.permute.xlu2 %1260 }
 0x2de   : > { %v992_v6 = vadd.f32 %v990_v14, %v986_v46  ;;  %v1236_v42 = vadd.f32 %v1234_v48, %v1230_v45 }
 0x2e1   : > { %v983_v51 = vpop.permute.xlu1 %982 }
 0x2e2   : > { %v987_v54 = vadd.f32 %v983_v51, %v973_v20 }
 0x2e3   : > { %v1227_v50 = vpop.permute.xlu0 %1226 }
 0x2e4   : > { %v993_v37 = vadd.f32 %v991_v52, %v987_v54  ;;  %v1231_v16 = vadd.f32 %v1227_v50, %v1217_v55 }
 0x2e6   : > { %v1237_v12 = vadd.f32 %v1235_v56, %v1231_v16  ;;  %v1007_v38 = vadd.f32 %v1003_v49, %v993_v37 }
 0x2e9   : > { %v1001_v58 = vpop.permute.xlu1 %1000 }
 0x2ea   : > { %v1006_v61 = vadd.f32 %v1001_v58, %v992_v6 }
 0x2eb   : > { %v1245_v22 = vpop.permute.xlu0 %1244 }
 0x2ec   : > { %v1020_v47 = vadd.f32 %v1015_v57, %v1006_v61  ;;  %v1250_v53 = vadd.f32 %v1245_v22, %v1236_v42 }
 0x2ee   : > { %v1517_v62 = vmul.f32 -1.442695, %v1020_v47 }
 0x2f0   : > { %1653 = vpow2.f32 %v1517_v62 }
 0x2f1   : > { %v1247_v63 = vpop.permute.xlu1 %1246 }
 0x2f2   : > { %v1251_v43 = vadd.f32 %v1247_v63, %v1237_v12 }
 0x2f3   : > { %v1017_v31 = vpop.permute.xlu0 %1016 }
 0x2f4   : > { %v1265_v0 = vadd.f32 %v1261_v9, %v1251_v43  ;;  %v1021_v2 = vadd.f32 %v1017_v31, %v1007_v38 }
 0x2f6   : > { %v1654_v3 = vpop.eup %1653  ;;  %v1539_v8 = vmul.f32 -1.442695, %v1265_v0  ;;  %v1518_v60 = vmul.f32 -1.442695, %v1021_v2 }
 0x2f7   : > { %v1028_v23 = vadd.f32 1.0, %v1654_v3 }
 0x2f8   : > { %1655 = vpow2.f32 %v1539_v8 }
 0x2f9   : > { %1657 = vrcp.f32 %v1028_v23  ;;  %v1259_v19 = vpop.permute.xlu1 %1258  ;;  %v1041_v27 = vand.u32 2147483648, %v1028_v23  ;;  %v1039_v59 = vand.u32 2147483647, %v1028_v23  ;;  %vm1035_vm13 = vweird.f32 %v1028_v23 }
 0x2fa   : > { %1659 = vpow2.f32 %v1518_v60  ;;  %v1264_v4 = vadd.f32 %v1259_v19, %v1250_v53 }
 0x2fb   : > { %v1042_v33 = vor.u32 1.1754944e-38, %v1041_v27  ;;  %vm1040_vm15 = vcmp.eq.f32.partialorder %v1039_v59, 8.507059e+37 }
 0x2fc   : > { %v1538_v24 = vmul.f32 -1.442695, %v1264_v4 }
 0x2fe   : > { %v1656_v5 = vpop.eup %1655  ;;  %1661 = vpow2.f32 %v1538_v24 }
 0x2ff   : > { %v1658_v30 = vpop.eup %1657  ;;  %v1273_v1 = vadd.f32 1.0, %v1656_v5 }
 0x300   : > { %v1660_v10 = vpop.eup %1659  ;;  %v1031_v11 = vmul.f32 %v1658_v30, %v1028_v23  ;;  %vm1036_vm12 = vweird.f32 %v1658_v30 }
 0x301   : > { %1663 = vrcp.f32 %v1273_v1  ;;  %v1029_v26 = vadd.f32 1.0, %v1660_v10  ;;  %vm1037_vm14 = vmor %vm1035_vm13, %vm1036_vm12  ;;  %v1300_v39 = vand.u32 2147483648, %v1273_v1  ;;  %v1298_v7 = vand.u32 2147483647, %v1273_v1 }
 0x302   : > { %v1032_v25 = vsub.f32 1.0, %v1031_v11  ;;  %vm1294_vm1 = vweird.f32 %v1273_v1 }
 0x303   : > { %1665 = vrcp.f32 %v1029_v26  ;;  %v1056_v46 = vand.u32 2147483648, %v1029_v26  ;;  %v1301_v48 = vor.u32 1.1754944e-38, %v1300_v39  ;;  %v1054_v42 = vand.u32 2147483647, %v1029_v26 }
 0x304   : > { %v1662_v13 = vpop.eup %1661  ;;  %v1033_v28 = vmul.f32 %v1658_v30, %v1032_v25  ;;  %vm1299_vm5 = vcmp.eq.f32.partialorder %v1298_v7, 8.507059e+37  ;;  %vm1050_vm6 = vweird.f32 %v1029_v26 }
 0x305   : > { %v1272_v18 = vadd.f32 1.0, %v1662_v13  ;;  %v1057_v55 = vor.u32 1.1754944e-38, %v1056_v46  ;;  %vm1055_vm9 = vcmp.eq.f32.partialorder %v1054_v42, 8.507059e+37 }
 0x306   : > { %v1034_v29 = vadd.f32 %v1658_v30, %v1033_v28 }
 0x307   : > { %v1664_v32 = vpop.eup %1663  ;;  %1667 = vrcp.f32 %v1272_v18  ;;  %v1285_v54 = vand.u32 2147483648, %v1272_v18  ;;  %v1283_v37 = vand.u32 2147483647, %v1272_v18  ;;  %vm1279_vm10 = vweird.f32 %v1272_v18 }
 0x308   : > { %v1038_v41 = vsel %vm1037_vm14, %v1658_v30, %v1034_v29  ;;  %v1290_v35 = vmul.f32 %v1664_v32, %v1273_v1  ;;  %vm1295_vm0 = vweird.f32 %v1664_v32 }
 0x309   : > { %v1043_v17 = vsel %vm1040_vm15, %v1042_v33, %v1038_v41  ;;  %v1666_v21 = vpop.eup %1665  ;;  %vm1296_vm2 = vmor %vm1294_vm1, %vm1295_vm0  ;;  %v1286_v57 = vor.u32 1.1754944e-38, %v1285_v54  ;;  %vm1284_vm12 = vcmp.eq.f32.partialorder %v1283_v37, 8.507059e+37 }
 0x30a   : > { %1540 = vst.msk [vmem:[%s2405_s8 + $0x10] sm:$0xff] %vm1304_vm4, %v1043_v17  ;;  %v1291_v36 = vsub.f32 1.0, %v1290_v35  ;;  %v1046_v34 = vmul.f32 %v1666_v21, %v1029_v26  ;;  %vm1051_vm3 = vweird.f32 %v1666_v21 }
 0x30b   : > { %vm1052_vm7 = vmor %vm1050_vm6, %vm1051_vm3 }
 0x30c   : > { %v1292_v40 = vmul.f32 %v1664_v32, %v1291_v36  ;;  %v1047_v44 = vsub.f32 1.0, %v1046_v34 }
 0x30d   : > { %v1668_v15 = vpop.eup %1667 }
 0x30e   : > { %v1293_v45 = vadd.f32 %v1664_v32, %v1292_v40  ;;  %v1275_v14 = vmul.f32 %v1668_v15, %v1272_v18  ;;  %v1048_v6 = vmul.f32 %v1666_v21, %v1047_v44  ;;  %vm1280_vm8 = vweird.f32 %v1668_v15 }
 0x30f   : > { %vm1281_vm11 = vmor %vm1279_vm10, %vm1280_vm8 }
 0x310   : > { %v1297_v49 = vsel %vm1296_vm2, %v1664_v32, %v1293_v45  ;;  %v1276_v20 = vsub.f32 1.0, %v1275_v14  ;;  %v1049_v52 = vadd.f32 %v1666_v21, %v1048_v6 }
 0x311   : > { %v1302_v51 = vsel %vm1299_vm5, %v1301_v48, %v1297_v49 }
 0x312   : > { %1543 = vst.msk [vmem:[%s2405_s8 + $0x28] sm:$0xff] %vm1304_vm4, %v1302_v51  ;;  %v1277_v50 = vmul.f32 %v1668_v15, %v1276_v20  ;;  %v1053_v16 = vsel %vm1052_vm7, %v1666_v21, %v1049_v52 }
 0x313   : > { %v1058_v56 = vsel %vm1055_vm9, %v1057_v55, %v1053_v16 }
 0x314   : > { %v1278_v12 = vadd.f32 %v1668_v15, %v1277_v50  ;;  %1541 = vst.msk [vmem:[%s2405_s8 + $0x18] sm:$0xff] %vm1304_vm4, %v1058_v56 }
 0x316   : > { %v1282_v58 = vsel %vm1281_vm11, %v1668_v15, %v1278_v12 }
 0x317   : > { %v1287_v61 = vsel %vm1284_vm12, %v1286_v57, %v1282_v58 }
 0x318   : > { %1542 = vst.msk [vmem:[%s2405_s8 + $0x20] sm:$0xff] %vm1304_vm4, %v1287_v61 }
 0x319   : > { %1786 = shalt.err (!%p1783_p11)
}
 0x31a   : > { %s1849_s12 = smov 128   ;;  %s1850_s8 = smov 8  }
 0x31b   : > { %1568 = dma.vmem_to_hbm [thread:$0]  (%p1956_p5), %s1327_s16, 768, %s1329_s7, %s1314_s15, %s1849_s12, %s1849_s12, %s1850_s8  }
 0x31c PF: > { %s1343_s26 = sand.u32 1, %s1825_s18   ;;  %p2488_p12 = scmp.ge.s32.totalorder %s1837_s21, 2 }
 0x31d   : > { %s1344_s29 = scalar_lea.sflag [#allocation6], %s1343_s26 }
 0x31e   : > { %p1588_p13 = pnand %p2488_p12, %p1916_p6 }
 0x320   : > { %p1589_p0 = pneg %p1588_p13 }
 0x322   : > { %1820 = dma.done.wait (%p1589_p0), %s1344_s29, 768  }
 0x323   : > { %1822 = vsyncadd (%p1589_p0), %s1344_s29, 4294966528  ;;  %p21_p3 = scmp.ge.s32.totalorder %s1943_s23, 4   ;;  %s2489_s18 = smov %s1829_s19 }
 0x324   : > { %s2490_s19 = smov %s1833_s20  ;;  %s2491_s20 = smov %s1952_s28 }
 0x325   : > { %s2492_s21 = smov %s1943_s23  ;;  %23 = sbr.rel (!%p21_p3) target bundleno = 8 (0x8), region = 106 }
 0x32a   :  { %1350 = vsyncpa [#allocation5], 1 }
 0x32b   :  { %1352 = vsyncpa [#allocation5 + $0x1], 1 }
 0x32c   :  { %1353 = vsyncpa [#allocation6], 1 }
 0x32d   :  { %1355 = vsyncpa [#allocation6 + $0x1], 1 }
 0x32e   :  { %1356 = vsyncpa [#allocation7], 1 }
 0x32f   :  { %1358 = vsyncpa [#allocation7 + $0x1], 1 }
 0x330   :  { %1359 = vsyncpa [#allocation8], 1 }
 0x331   :  { %1361 = vsyncpa [#allocation8 + $0x1], 1 }
 0x332   :  { %1362 = vsyncpa [#allocation12], 1 }

</bundles_post_ra>
